<compile_context>
chip_gen: v7x
topology: tpu7x:2x2x1
jax: 0.10.0
libtpu: 0.0.40
codegen_flags: <defaults>
</compile_context>

<pallas_src>
import math

import jax
import jax.numpy as jnp
from jax.experimental import pallas as pl
from jax.experimental.pallas import tpu as pltpu


# ----------------------------------------------------------------------------
# Fused Pallas kernel (single invocation: all layers + pooling)
# ----------------------------------------------------------------------------
def make_fused_lstm_kernel(num_layers, B, T, D, H):
    """Ref order: x(T,B,D)bf16, mask(T,B,1)f32, [wih,whh,b]*L, out(B,H)f32, gx_buf, y_buf."""

    def kernel(*refs):
        x_ref = refs[0]                              # (T, B, D)   bf16, time-major
        mask_ref = refs[1]                           # (T, B, 1)   f32
        w_refs = refs[2:2 + 3 * num_layers]          # per-layer weights (VMEM)
        o_ref = refs[2 + 3 * num_layers]             # (B, H)      f32 output
        gx_buf = refs[3 + 3 * num_layers]            # (T, B, 4H)  f32 scratch (input proj)
        y_buf = refs[4 + 3 * num_layers]             # (T, B, H)   bf16 scratch (layer acts)

        for l in range(num_layers):
            wih = w_refs[3 * l + 0][...]             # (in_dim, 4H) bf16
            whh = w_refs[3 * l + 1][...]             # (H, 4H)      bf16
            b = w_refs[3 * l + 2][...]               # (1, 4H)      f32

            # Layer input, flattened over (T, B) — already bf16, contiguous reshape.
            if l == 0:
                cur = x_ref[...].reshape(T * B, D)
            else:
                cur = y_buf[...].reshape(T * B, H)

            # ---- hoisted input projection: ONE batched MXU matmul, staged time-major.
            gx_buf[...] = (
                jnp.dot(cur, wih, preferred_element_type=jnp.float32) + b
            ).reshape(T, B, 4 * H)

            def step(t, carry, whh=whh):
                h, c = carry
                # (B, 4H) f32 gates: contiguous leading-index load + small recurrent matmul.
                gates = gx_buf[t] + jnp.dot(
                    h.astype(jnp.bfloat16), whh, preferred_element_type=jnp.float32
                )
                # Two full-slab EUP pushes instead of four quarter-width ones.
                sg = jax.nn.sigmoid(gates)           # i, f, -, o come from here
                th = jnp.tanh(gates)                 # g comes from here
                i_g = sg[:, 0 * H:1 * H]
                f_g = sg[:, 1 * H:2 * H]
                g_g = th[:, 2 * H:3 * H]
                o_g = sg[:, 3 * H:4 * H]
                c = f_g * c + i_g * g_g
                h = o_g * jnp.tanh(c)
                y_buf[t] = h.astype(jnp.bfloat16)    # contiguous leading-index store
                return (h, c)

            carry = (jnp.zeros((B, H), jnp.float32), jnp.zeros((B, H), jnp.float32))
            if T <= 32:
                # Short sequence: static unroll -> full LLO scheduling visibility.
                for t in range(T):
                    carry = step(t, carry)
            else:
                # Long sequence: bounded live ranges, modest unroll.
                carry = jax.lax.fori_loop(0, T, step, carry, unroll=8)

        # ---- masked mean pooling, one vectorized pass off the serial critical path.
        mask = mask_ref[...]                         # (T, B, 1)
        y_all = y_buf[...].astype(jnp.float32)       # (T, B, H)
        pooled = jnp.sum(y_all * mask, axis=0)       # (B, H)
        den = jnp.sum(mask, axis=0)                  # (B, 1)  == mask.sum(dim=1)
        o_ref[...] = pooled / den                    # plain divide (torch.div semantics)

    return kernel


# ----------------------------------------------------------------------------
# Wrapper
# ----------------------------------------------------------------------------
@jax.jit
def lstm_model_forward(sentence_inp, mask, embeddings, lstm_params):
    """Reproduces LSTM.forward: embed -> num_layers LSTM (batch_first, zero init state)
    -> dropout(identity) -> masked average over the sequence dim. Returns (B, H) f32."""
    B, T = sentence_inp.shape
    D = embeddings.shape[1]
    num_layers = len(lstm_params)
    H = lstm_params[0][1].shape[1]                   # w_hh: (4H, H)

    # Pad batch to the sublane width (8). Padded rows carry mask == 0 and are dropped below
    # (their 0/0 pooling result never touches real rows: division is elementwise).
    B_pad = max(8, ((B + 7) // 8) * 8)
    pad = B_pad - B
    tok = jnp.pad(sentence_inp, ((0, pad), (0, 0)))
    msk = jnp.pad(mask.astype(jnp.float32), ((0, pad), (0, 0)))

    # Embedding gather fused with the bf16 cast and the time-major transpose:
    # the kernel receives MXU-ready activations, no in-kernel cast or relayout.
    # NOTE: the PyTorch module overwrites embedding weights with the provided table,
    # so the padding row is NOT re-zeroed -- we faithfully use the table as given.
    x = embeddings.astype(jnp.bfloat16)[tok.T]       # (T, B_pad, D) bf16
    mask_t = msk.T[:, :, None]                       # (T, B_pad, 1) f32

    # Weight prep: transpose to (in, 4H), bf16 for the MXU, fold the two biases.
    flat = []
    for (w_ih, w_hh, b_ih, b_hh) in lstm_params:
        flat.append(jnp.transpose(w_ih).astype(jnp.bfloat16))             # (in_dim, 4H)
        flat.append(jnp.transpose(w_hh).astype(jnp.bfloat16))             # (H, 4H)
        flat.append((b_ih + b_hh).reshape(1, 4 * H).astype(jnp.float32))  # (1, 4H)

    kernel = make_fused_lstm_kernel(num_layers, B_pad, T, D, H)
    out = pl.pallas_call(
        kernel,
        out_shape=jax.ShapeDtypeStruct((B_pad, H), jnp.float32),
        # Full-array blocks (no grid): everything resident in VMEM for the one invocation.
        scratch_shapes=[
            pltpu.VMEM((T, B_pad, 4 * H), jnp.float32),   # staged input projection
            pltpu.VMEM((T, B_pad, H), jnp.bfloat16),      # inter-layer activations
        ],
    )(x, mask_t, *flat)
    return out[:B]


# ----------------------------------------------------------------------------
# Pure-JAX fp32 reference (mirrors the PyTorch forward exactly)
# ----------------------------------------------------------------------------
def lstm_reference(sentence_inp, mask, embeddings, lstm_params):
    x = embeddings[sentence_inp].astype(jnp.float32)          # (B, T, D)
    B, T, _ = x.shape
    for (w_ih, w_hh, b_ih, b_hh) in lstm_params:
        H = w_hh.shape[1]
        b = b_ih + b_hh
        h = jnp.zeros((B, H), jnp.float32)
        c = jnp.zeros((B, H), jnp.float32)
        ys = []
        for t in range(T):
            gates = x[:, t, :] @ w_ih.T + h @ w_hh.T + b
            i_g = jax.nn.sigmoid(gates[:, 0 * H:1 * H])
            f_g = jax.nn.sigmoid(gates[:, 1 * H:2 * H])
            g_g = jnp.tanh(gates[:, 2 * H:3 * H])
            o_g = jax.nn.sigmoid(gates[:, 3 * H:4 * H])
            c = f_g * c + i_g * g_g
            h = o_g * jnp.tanh(c)
            ys.append(h)
        x = jnp.stack(ys, axis=1)                             # (B, T, H)
    num = jnp.sum(x * mask[:, :, None], axis=1)
    den = jnp.sum(mask, axis=1, keepdims=True)
    return num / den


# ----------------------------------------------------------------------------
# Main
# ----------------------------------------------------------------------------
if __name__ == "__main__":
    vocab_size = 50
    embed_dim = 16
    hidden_dim = 32
    num_layers = 2
    padding_idx = 0
    batch = 4
    seq_len = 8

    key = jax.random.PRNGKey(0)
    key, k_emb, k_tok = jax.random.split(key, 3)

    # Frozen embedding table (stand-in for the pretrained `embeddings` argument).
    embeddings = jax.random.normal(k_emb, (vocab_size, embed_dim), jnp.float32)

    # nn.LSTM-style parameters (shapes and U(-1/sqrt(H), 1/sqrt(H)) init).
    params = []
    kinit = 1.0 / math.sqrt(hidden_dim)
    for layer in range(num_layers):
        in_dim = embed_dim if layer == 0 else hidden_dim
        key, k1, k2, k3, k4 = jax.random.split(key, 5)
        w_ih = jax.random.uniform(k1, (4 * hidden_dim, in_dim), jnp.float32, -kinit, kinit)
        w_hh = jax.random.uniform(k2, (4 * hidden_dim, hidden_dim), jnp.float32, -kinit, kinit)
        b_ih = jax.random.uniform(k3, (4 * hidden_dim,), jnp.float32, -kinit, kinit)
        b_hh = jax.random.uniform(k4, (4 * hidden_dim,), jnp.float32, -kinit, kinit)
        params.append((w_ih, w_hh, b_ih, b_hh))
    lstm_params = tuple(params)

    # Token ids and padding mask (every real row has mask.sum > 0).
    sentence_inp = jax.random.randint(k_tok, (batch, seq_len), 0, vocab_size, dtype=jnp.int32)
    lengths = jnp.array([8, 5, 3, 6], dtype=jnp.int32)
    positions = jnp.arange(seq_len, dtype=jnp.int32)[None, :]
    mask = (positions < lengths[:, None]).astype(jnp.float32)              # (B, T)
    sentence_inp = jnp.where(mask > 0, sentence_inp, padding_idx).astype(jnp.int32)

    out = lstm_model_forward(sentence_inp, mask, embeddings, lstm_params)
    out = jax.block_until_ready(out)

    ref = jax.block_until_ready(lstm_reference(sentence_inp, mask, embeddings, lstm_params))

    assert out.shape == (batch, hidden_dim)
    assert out.dtype == jnp.float32
    assert bool(jnp.all(jnp.isfinite(out)))
    # bf16 matmul inputs / inter-layer activations, fp32 gate math -> loose tolerance vs fp32.
    assert float(jnp.max(jnp.abs(out - ref))) < 0.1
    print("KERNEL_OK")
</pallas_src>

<mosaic_0001>
module attributes {stable_mosaic.version = 11 : i64} {
  func.func @kernel(%arg0: memref<8x8x16xbf16, #tpu.memory_space<vmem>>, %arg1: memref<8x8x1xf32, #tpu.memory_space<vmem>>, %arg2: memref<16x128xbf16, #tpu.memory_space<vmem>>, %arg3: memref<32x128xbf16, #tpu.memory_space<vmem>>, %arg4: memref<1x128xf32, #tpu.memory_space<vmem>>, %arg5: memref<32x128xbf16, #tpu.memory_space<vmem>>, %arg6: memref<32x128xbf16, #tpu.memory_space<vmem>>, %arg7: memref<1x128xf32, #tpu.memory_space<vmem>>, %arg8: memref<8x32xf32, #tpu.memory_space<vmem>>, %arg9: memref<8x8x128xf32, #tpu.memory_space<vmem>>, %arg10: memref<8x8x32xbf16, #tpu.memory_space<vmem>>) attributes {dimension_semantics = [], scalar_prefetch = 0 : i64, scratch_operands = 2 : i64, tpu.core_type = #tpu.core_type<tc>} {
    %c0 = arith.constant 0 : index
    %c0_0 = arith.constant 0 : index
    %0 = vector.load %arg2[%c0, %c0_0] : memref<16x128xbf16, #tpu.memory_space<vmem>>, vector<16x128xbf16>
    %c0_1 = arith.constant 0 : index
    %c0_2 = arith.constant 0 : index
    %1 = vector.load %arg3[%c0_1, %c0_2] : memref<32x128xbf16, #tpu.memory_space<vmem>>, vector<32x128xbf16>
    %c0_3 = arith.constant 0 : index
    %c0_4 = arith.constant 0 : index
    %2 = vector.load %arg4[%c0_3, %c0_4] : memref<1x128xf32, #tpu.memory_space<vmem>>, vector<1x128xf32>
    %c0_5 = arith.constant 0 : index
    %c0_6 = arith.constant 0 : index
    %c0_7 = arith.constant 0 : index
    %3 = vector.load %arg0[%c0_5, %c0_6, %c0_7] : memref<8x8x16xbf16, #tpu.memory_space<vmem>>, vector<8x8x16xbf16>
    %4 = vector.shape_cast %3 : vector<8x8x16xbf16> to vector<64x16xbf16>
    %cst = arith.constant dense<0.000000e+00> : vector<64x128xf32>
    %5 = tpu.matmul %4, %0, %cst {dimension_numbers = #tpu.dot_dimension_numbers<[1], [0], [0], [1], [0, 0, 1, 1], [], []>} : vector<64x16xbf16>, vector<16x128xbf16>, vector<64x128xf32> -> vector<64x128xf32>
    %6 = vector.broadcast %2 : vector<1x128xf32> to vector<64x128xf32>
    %7 = arith.addf %5, %6 : vector<64x128xf32>
    %8 = vector.shape_cast %7 : vector<64x128xf32> to vector<8x8x128xf32>
    %c0_8 = arith.constant 0 : index
    %c0_9 = arith.constant 0 : index
    %c0_10 = arith.constant 0 : index
    %9 = vector.load %arg9[%c0_8, %c0_9, %c0_10] : memref<8x8x128xf32, #tpu.memory_space<vmem>>, vector<8x8x128xf32>
    tpu.vector_store %arg9[%c0_8, %c0_9, %c0_10], %8 {strides = array<i32>} : memref<8x8x128xf32, #tpu.memory_space<vmem>>, vector<8x8x128xf32>,
    %cst_11 = arith.constant 0.000000e+00 : f32
    %10 = vector.broadcast %cst_11 : f32 to vector<8x32xf32>
    %cst_12 = arith.constant 0.000000e+00 : f32
    %11 = vector.broadcast %cst_12 : f32 to vector<8x32xf32>
    %c0_13 = arith.constant 0 : index
    %c0_14 = arith.constant 0 : index
    %c0_15 = arith.constant 0 : index
    %12 = vector.load %arg9[%c0_13, %c0_14, %c0_15] : memref<8x8x128xf32, #tpu.memory_space<vmem>>, vector<1x8x128xf32>
    %13 = vector.shape_cast %12 : vector<1x8x128xf32> to vector<8x128xf32>
    %14 = arith.truncf %10 : vector<8x32xf32> to vector<8x32xbf16>
    %cst_16 = arith.constant dense<0.000000e+00> : vector<8x128xf32>
    %15 = tpu.matmul %14, %1, %cst_16 {dimension_numbers = #tpu.dot_dimension_numbers<[1], [0], [0], [1], [0, 0, 1, 1], [], []>} : vector<8x32xbf16>, vector<32x128xbf16>, vector<8x128xf32> -> vector<8x128xf32>
    %16 = arith.addf %13, %15 : vector<8x128xf32>
    %17 = arith.negf %16 : vector<8x128xf32>
    %18 = math.exp %17 : vector<8x128xf32>
    %cst_17 = arith.constant 1.000000e+00 : f32
    %19 = vector.broadcast %cst_17 : f32 to vector<8x128xf32>
    %20 = arith.addf %19, %18 : vector<8x128xf32>
    %21 = arith.divf %19, %20 : vector<8x128xf32>
    %22 = math.tanh %16 : vector<8x128xf32>
    %23 = vector.extract_strided_slice %21 {offsets = [0, 0], sizes = [8, 32], strides = [1, 1]} : vector<8x128xf32> to vector<8x32xf32>
    %24 = vector.extract_strided_slice %21 {offsets = [0, 32], sizes = [8, 32], strides = [1, 1]} : vector<8x128xf32> to vector<8x32xf32>
    %25 = vector.extract_strided_slice %22 {offsets = [0, 64], sizes = [8, 32], strides = [1, 1]} : vector<8x128xf32> to vector<8x32xf32>
    %26 = vector.extract_strided_slice %21 {offsets = [0, 96], sizes = [8, 32], strides = [1, 1]} : vector<8x128xf32> to vector<8x32xf32>
    %27 = arith.mulf %24, %11 : vector<8x32xf32>
    %28 = arith.mulf %23, %25 : vector<8x32xf32>
    %29 = arith.addf %27, %28 : vector<8x32xf32>
    %30 = math.tanh %29 : vector<8x32xf32>
    %31 = arith.mulf %26, %30 : vector<8x32xf32>
    %32 = arith.truncf %31 : vector<8x32xf32> to vector<8x32xbf16>
    %c0_18 = arith.constant 0 : index
    %c0_19 = arith.constant 0 : index
    %c0_20 = arith.constant 0 : index
    %33 = vector.load %arg10[%c0_18, %c0_19, %c0_20] : memref<8x8x32xbf16, #tpu.memory_space<vmem>>, vector<1x8x32xbf16>
    %34 = vector.shape_cast %33 : vector<1x8x32xbf16> to vector<8x32xbf16>
    %35 = vector.shape_cast %32 : vector<8x32xbf16> to vector<1x8x32xbf16>
    tpu.vector_store %arg10[%c0_18, %c0_19, %c0_20], %35 {strides = array<i32>} : memref<8x8x32xbf16, #tpu.memory_space<vmem>>, vector<1x8x32xbf16>,
    %c1 = arith.constant 1 : index
    %c0_21 = arith.constant 0 : index
    %c0_22 = arith.constant 0 : index
    %36 = vector.load %arg9[%c1, %c0_21, %c0_22] : memref<8x8x128xf32, #tpu.memory_space<vmem>>, vector<1x8x128xf32>
    %37 = vector.shape_cast %36 : vector<1x8x128xf32> to vector<8x128xf32>
    %38 = arith.truncf %31 : vector<8x32xf32> to vector<8x32xbf16>
    %cst_23 = arith.constant dense<0.000000e+00> : vector<8x128xf32>
    %39 = tpu.matmul %38, %1, %cst_23 {dimension_numbers = #tpu.dot_dimension_numbers<[1], [0], [0], [1], [0, 0, 1, 1], [], []>} : vector<8x32xbf16>, vector<32x128xbf16>, vector<8x128xf32> -> vector<8x128xf32>
    %40 = arith.addf %37, %39 : vector<8x128xf32>
    %41 = arith.negf %40 : vector<8x128xf32>
    %42 = math.exp %41 : vector<8x128xf32>
    %cst_24 = arith.constant 1.000000e+00 : f32
    %43 = vector.broadcast %cst_24 : f32 to vector<8x128xf32>
    %44 = arith.addf %43, %42 : vector<8x128xf32>
    %45 = arith.divf %43, %44 : vector<8x128xf32>
    %46 = math.tanh %40 : vector<8x128xf32>
    %47 = vector.extract_strided_slice %45 {offsets = [0, 0], sizes = [8, 32], strides = [1, 1]} : vector<8x128xf32> to vector<8x32xf32>
    %48 = vector.extract_strided_slice %45 {offsets = [0, 32], sizes = [8, 32], strides = [1, 1]} : vector<8x128xf32> to vector<8x32xf32>
    %49 = vector.extract_strided_slice %46 {offsets = [0, 64], sizes = [8, 32], strides = [1, 1]} : vector<8x128xf32> to vector<8x32xf32>
    %50 = vector.extract_strided_slice %45 {offsets = [0, 96], sizes = [8, 32], strides = [1, 1]} : vector<8x128xf32> to vector<8x32xf32>
    %51 = arith.mulf %48, %29 : vector<8x32xf32>
    %52 = arith.mulf %47, %49 : vector<8x32xf32>
    %53 = arith.addf %51, %52 : vector<8x32xf32>
    %54 = math.tanh %53 : vector<8x32xf32>
    %55 = arith.mulf %50, %54 : vector<8x32xf32>
    %56 = arith.truncf %55 : vector<8x32xf32> to vector<8x32xbf16>
    %c1_25 = arith.constant 1 : index
    %c0_26 = arith.constant 0 : index
    %c0_27 = arith.constant 0 : index
    %57 = vector.load %arg10[%c1_25, %c0_26, %c0_27] : memref<8x8x32xbf16, #tpu.memory_space<vmem>>, vector<1x8x32xbf16>
    %58 = vector.shape_cast %57 : vector<1x8x32xbf16> to vector<8x32xbf16>
    %59 = vector.shape_cast %56 : vector<8x32xbf16> to vector<1x8x32xbf16>
    tpu.vector_store %arg10[%c1_25, %c0_26, %c0_27], %59 {strides = array<i32>} : memref<8x8x32xbf16, #tpu.memory_space<vmem>>, vector<1x8x32xbf16>,
    %c2 = arith.constant 2 : index
    %c0_28 = arith.constant 0 : index
    %c0_29 = arith.constant 0 : index
    %60 = vector.load %arg9[%c2, %c0_28, %c0_29] : memref<8x8x128xf32, #tpu.memory_space<vmem>>, vector<1x8x128xf32>
    %61 = vector.shape_cast %60 : vector<1x8x128xf32> to vector<8x128xf32>
    %62 = arith.truncf %55 : vector<8x32xf32> to vector<8x32xbf16>
    %cst_30 = arith.constant dense<0.000000e+00> : vector<8x128xf32>
    %63 = tpu.matmul %62, %1, %cst_30 {dimension_numbers = #tpu.dot_dimension_numbers<[1], [0], [0], [1], [0, 0, 1, 1], [], []>} : vector<8x32xbf16>, vector<32x128xbf16>, vector<8x128xf32> -> vector<8x128xf32>
    %64 = arith.addf %61, %63 : vector<8x128xf32>
    %65 = arith.negf %64 : vector<8x128xf32>
    %66 = math.exp %65 : vector<8x128xf32>
    %cst_31 = arith.constant 1.000000e+00 : f32
    %67 = vector.broadcast %cst_31 : f32 to vector<8x128xf32>
    %68 = arith.addf %67, %66 : vector<8x128xf32>
    %69 = arith.divf %67, %68 : vector<8x128xf32>
    %70 = math.tanh %64 : vector<8x128xf32>
    %71 = vector.extract_strided_slice %69 {offsets = [0, 0], sizes = [8, 32], strides = [1, 1]} : vector<8x128xf32> to vector<8x32xf32>
    %72 = vector.extract_strided_slice %69 {offsets = [0, 32], sizes = [8, 32], strides = [1, 1]} : vector<8x128xf32> to vector<8x32xf32>
    %73 = vector.extract_strided_slice %70 {offsets = [0, 64], sizes = [8, 32], strides = [1, 1]} : vector<8x128xf32> to vector<8x32xf32>
    %74 = vector.extract_strided_slice %69 {offsets = [0, 96], sizes = [8, 32], strides = [1, 1]} : vector<8x128xf32> to vector<8x32xf32>
    %75 = arith.mulf %72, %53 : vector<8x32xf32>
    %76 = arith.mulf %71, %73 : vector<8x32xf32>
    %77 = arith.addf %75, %76 : vector<8x32xf32>
    %78 = math.tanh %77 : vector<8x32xf32>
    %79 = arith.mulf %74, %78 : vector<8x32xf32>
    %80 = arith.truncf %79 : vector<8x32xf32> to vector<8x32xbf16>
    %c2_32 = arith.constant 2 : index
    %c0_33 = arith.constant 0 : index
    %c0_34 = arith.constant 0 : index
    %81 = vector.load %arg10[%c2_32, %c0_33, %c0_34] : memref<8x8x32xbf16, #tpu.memory_space<vmem>>, vector<1x8x32xbf16>
    %82 = vector.shape_cast %81 : vector<1x8x32xbf16> to vector<8x32xbf16>
    %83 = vector.shape_cast %80 : vector<8x32xbf16> to vector<1x8x32xbf16>
    tpu.vector_store %arg10[%c2_32, %c0_33, %c0_34], %83 {strides = array<i32>} : memref<8x8x32xbf16, #tpu.memory_space<vmem>>, vector<1x8x32xbf16>,
    %c3 = arith.constant 3 : index
    %c0_35 = arith.constant 0 : index
    %c0_36 = arith.constant 0 : index
    %84 = vector.load %arg9[%c3, %c0_35, %c0_36] : memref<8x8x128xf32, #tpu.memory_space<vmem>>, vector<1x8x128xf32>
    %85 = vector.shape_cast %84 : vector<1x8x128xf32> to vector<8x128xf32>
    %86 = arith.truncf %79 : vector<8x32xf32> to vector<8x32xbf16>
    %cst_37 = arith.constant dense<0.000000e+00> : vector<8x128xf32>
    %87 = tpu.matmul %86, %1, %cst_37 {dimension_numbers = #tpu.dot_dimension_numbers<[1], [0], [0], [1], [0, 0, 1, 1], [], []>} : vector<8x32xbf16>, vector<32x128xbf16>, vector<8x128xf32> -> vector<8x128xf32>
    %88 = arith.addf %85, %87 : vector<8x128xf32>
    %89 = arith.negf %88 : vector<8x128xf32>
    %90 = math.exp %89 : vector<8x128xf32>
    %cst_38 = arith.constant 1.000000e+00 : f32
    %91 = vector.broadcast %cst_38 : f32 to vector<8x128xf32>
    %92 = arith.addf %91, %90 : vector<8x128xf32>
    %93 = arith.divf %91, %92 : vector<8x128xf32>
    %94 = math.tanh %88 : vector<8x128xf32>
    %95 = vector.extract_strided_slice %93 {offsets = [0, 0], sizes = [8, 32], strides = [1, 1]} : vector<8x128xf32> to vector<8x32xf32>
    %96 = vector.extract_strided_slice %93 {offsets = [0, 32], sizes = [8, 32], strides = [1, 1]} : vector<8x128xf32> to vector<8x32xf32>
    %97 = vector.extract_strided_slice %94 {offsets = [0, 64], sizes = [8, 32], strides = [1, 1]} : vector<8x128xf32> to vector<8x32xf32>
    %98 = vector.extract_strided_slice %93 {offsets = [0, 96], sizes = [8, 32], strides = [1, 1]} : vector<8x128xf32> to vector<8x32xf32>
    %99 = arith.mulf %96, %77 : vector<8x32xf32>
    %100 = arith.mulf %95, %97 : vector<8x32xf32>
    %101 = arith.addf %99, %100 : vector<8x32xf32>
    %102 = math.tanh %101 : vector<8x32xf32>
    %103 = arith.mulf %98, %102 : vector<8x32xf32>
    %104 = arith.truncf %103 : vector<8x32xf32> to vector<8x32xbf16>
    %c3_39 = arith.constant 3 : index
    %c0_40 = arith.constant 0 : index
    %c0_41 = arith.constant 0 : index
    %105 = vector.load %arg10[%c3_39, %c0_40, %c0_41] : memref<8x8x32xbf16, #tpu.memory_space<vmem>>, vector<1x8x32xbf16>
    %106 = vector.shape_cast %105 : vector<1x8x32xbf16> to vector<8x32xbf16>
    %107 = vector.shape_cast %104 : vector<8x32xbf16> to vector<1x8x32xbf16>
    tpu.vector_store %arg10[%c3_39, %c0_40, %c0_41], %107 {strides = array<i32>} : memref<8x8x32xbf16, #tpu.memory_space<vmem>>, vector<1x8x32xbf16>,
    %c4 = arith.constant 4 : index
    %c0_42 = arith.constant 0 : index
    %c0_43 = arith.constant 0 : index
    %108 = vector.load %arg9[%c4, %c0_42, %c0_43] : memref<8x8x128xf32, #tpu.memory_space<vmem>>, vector<1x8x128xf32>
    %109 = vector.shape_cast %108 : vector<1x8x128xf32> to vector<8x128xf32>
    %110 = arith.truncf %103 : vector<8x32xf32> to vector<8x32xbf16>
    %cst_44 = arith.constant dense<0.000000e+00> : vector<8x128xf32>
    %111 = tpu.matmul %110, %1, %cst_44 {dimension_numbers = #tpu.dot_dimension_numbers<[1], [0], [0], [1], [0, 0, 1, 1], [], []>} : vector<8x32xbf16>, vector<32x128xbf16>, vector<8x128xf32> -> vector<8x128xf32>
    %112 = arith.addf %109, %111 : vector<8x128xf32>
    %113 = arith.negf %112 : vector<8x128xf32>
    %114 = math.exp %113 : vector<8x128xf32>
    %cst_45 = arith.constant 1.000000e+00 : f32
    %115 = vector.broadcast %cst_45 : f32 to vector<8x128xf32>
    %116 = arith.addf %115, %114 : vector<8x128xf32>
    %117 = arith.divf %115, %116 : vector<8x128xf32>
    %118 = math.tanh %112 : vector<8x128xf32>
    %119 = vector.extract_strided_slice %117 {offsets = [0, 0], sizes = [8, 32], strides = [1, 1]} : vector<8x128xf32> to vector<8x32xf32>
    %120 = vector.extract_strided_slice %117 {offsets = [0, 32], sizes = [8, 32], strides = [1, 1]} : vector<8x128xf32> to vector<8x32xf32>
    %121 = vector.extract_strided_slice %118 {offsets = [0, 64], sizes = [8, 32], strides = [1, 1]} : vector<8x128xf32> to vector<8x32xf32>
    %122 = vector.extract_strided_slice %117 {offsets = [0, 96], sizes = [8, 32], strides = [1, 1]} : vector<8x128xf32> to vector<8x32xf32>
    %123 = arith.mulf %120, %101 : vector<8x32xf32>
    %124 = arith.mulf %119, %121 : vector<8x32xf32>
    %125 = arith.addf %123, %124 : vector<8x32xf32>
    %126 = math.tanh %125 : vector<8x32xf32>
    %127 = arith.mulf %122, %126 : vector<8x32xf32>
    %128 = arith.truncf %127 : vector<8x32xf32> to vector<8x32xbf16>
    %c4_46 = arith.constant 4 : index
    %c0_47 = arith.constant 0 : index
    %c0_48 = arith.constant 0 : index
    %129 = vector.load %arg10[%c4_46, %c0_47, %c0_48] : memref<8x8x32xbf16, #tpu.memory_space<vmem>>, vector<1x8x32xbf16>
    %130 = vector.shape_cast %129 : vector<1x8x32xbf16> to vector<8x32xbf16>
    %131 = vector.shape_cast %128 : vector<8x32xbf16> to vector<1x8x32xbf16>
    tpu.vector_store %arg10[%c4_46, %c0_47, %c0_48], %131 {strides = array<i32>} : memref<8x8x32xbf16, #tpu.memory_space<vmem>>, vector<1x8x32xbf16>,
    %c5 = arith.constant 5 : index
    %c0_49 = arith.constant 0 : index
    %c0_50 = arith.constant 0 : index
    %132 = vector.load %arg9[%c5, %c0_49, %c0_50] : memref<8x8x128xf32, #tpu.memory_space<vmem>>, vector<1x8x128xf32>
    %133 = vector.shape_cast %132 : vector<1x8x128xf32> to vector<8x128xf32>
    %134 = arith.truncf %127 : vector<8x32xf32> to vector<8x32xbf16>
    %cst_51 = arith.constant dense<0.000000e+00> : vector<8x128xf32>
    %135 = tpu.matmul %134, %1, %cst_51 {dimension_numbers = #tpu.dot_dimension_numbers<[1], [0], [0], [1], [0, 0, 1, 1], [], []>} : vector<8x32xbf16>, vector<32x128xbf16>, vector<8x128xf32> -> vector<8x128xf32>
    %136 = arith.addf %133, %135 : vector<8x128xf32>
    %137 = arith.negf %136 : vector<8x128xf32>
    %138 = math.exp %137 : vector<8x128xf32>
    %cst_52 = arith.constant 1.000000e+00 : f32
    %139 = vector.broadcast %cst_52 : f32 to vector<8x128xf32>
    %140 = arith.addf %139, %138 : vector<8x128xf32>
    %141 = arith.divf %139, %140 : vector<8x128xf32>
    %142 = math.tanh %136 : vector<8x128xf32>
    %143 = vector.extract_strided_slice %141 {offsets = [0, 0], sizes = [8, 32], strides = [1, 1]} : vector<8x128xf32> to vector<8x32xf32>
    %144 = vector.extract_strided_slice %141 {offsets = [0, 32], sizes = [8, 32], strides = [1, 1]} : vector<8x128xf32> to vector<8x32xf32>
    %145 = vector.extract_strided_slice %142 {offsets = [0, 64], sizes = [8, 32], strides = [1, 1]} : vector<8x128xf32> to vector<8x32xf32>
    %146 = vector.extract_strided_slice %141 {offsets = [0, 96], sizes = [8, 32], strides = [1, 1]} : vector<8x128xf32> to vector<8x32xf32>
    %147 = arith.mulf %144, %125 : vector<8x32xf32>
    %148 = arith.mulf %143, %145 : vector<8x32xf32>
    %149 = arith.addf %147, %148 : vector<8x32xf32>
    %150 = math.tanh %149 : vector<8x32xf32>
    %151 = arith.mulf %146, %150 : vector<8x32xf32>
    %152 = arith.truncf %151 : vector<8x32xf32> to vector<8x32xbf16>
    %c5_53 = arith.constant 5 : index
    %c0_54 = arith.constant 0 : index
    %c0_55 = arith.constant 0 : index
    %153 = vector.load %arg10[%c5_53, %c0_54, %c0_55] : memref<8x8x32xbf16, #tpu.memory_space<vmem>>, vector<1x8x32xbf16>
    %154 = vector.shape_cast %153 : vector<1x8x32xbf16> to vector<8x32xbf16>
    %155 = vector.shape_cast %152 : vector<8x32xbf16> to vector<1x8x32xbf16>
    tpu.vector_store %arg10[%c5_53, %c0_54, %c0_55], %155 {strides = array<i32>} : memref<8x8x32xbf16, #tpu.memory_space<vmem>>, vector<1x8x32xbf16>,
    %c6 = arith.constant 6 : index
    %c0_56 = arith.constant 0 : index
    %c0_57 = arith.constant 0 : index
    %156 = vector.load %arg9[%c6, %c0_56, %c0_57] : memref<8x8x128xf32, #tpu.memory_space<vmem>>, vector<1x8x128xf32>
    %157 = vector.shape_cast %156 : vector<1x8x128xf32> to vector<8x128xf32>
    %158 = arith.truncf %151 : vector<8x32xf32> to vector<8x32xbf16>
    %cst_58 = arith.constant dense<0.000000e+00> : vector<8x128xf32>
    %159 = tpu.matmul %158, %1, %cst_58 {dimension_numbers = #tpu.dot_dimension_numbers<[1], [0], [0], [1], [0, 0, 1, 1], [], []>} : vector<8x32xbf16>, vector<32x128xbf16>, vector<8x128xf32> -> vector<8x128xf32>
    %160 = arith.addf %157, %159 : vector<8x128xf32>
    %161 = arith.negf %160 : vector<8x128xf32>
    %162 = math.exp %161 : vector<8x128xf32>
    %cst_59 = arith.constant 1.000000e+00 : f32
    %163 = vector.broadcast %cst_59 : f32 to vector<8x128xf32>
    %164 = arith.addf %163, %162 : vector<8x128xf32>
    %165 = arith.divf %163, %164 : vector<8x128xf32>
    %166 = math.tanh %160 : vector<8x128xf32>
    %167 = vector.extract_strided_slice %165 {offsets = [0, 0], sizes = [8, 32], strides = [1, 1]} : vector<8x128xf32> to vector<8x32xf32>
    %168 = vector.extract_strided_slice %165 {offsets = [0, 32], sizes = [8, 32], strides = [1, 1]} : vector<8x128xf32> to vector<8x32xf32>
    %169 = vector.extract_strided_slice %166 {offsets = [0, 64], sizes = [8, 32], strides = [1, 1]} : vector<8x128xf32> to vector<8x32xf32>
    %170 = vector.extract_strided_slice %165 {offsets = [0, 96], sizes = [8, 32], strides = [1, 1]} : vector<8x128xf32> to vector<8x32xf32>
    %171 = arith.mulf %168, %149 : vector<8x32xf32>
    %172 = arith.mulf %167, %169 : vector<8x32xf32>
    %173 = arith.addf %171, %172 : vector<8x32xf32>
    %174 = math.tanh %173 : vector<8x32xf32>
    %175 = arith.mulf %170, %174 : vector<8x32xf32>
    %176 = arith.truncf %175 : vector<8x32xf32> to vector<8x32xbf16>
    %c6_60 = arith.constant 6 : index
    %c0_61 = arith.constant 0 : index
    %c0_62 = arith.constant 0 : index
    %177 = vector.load %arg10[%c6_60, %c0_61, %c0_62] : memref<8x8x32xbf16, #tpu.memory_space<vmem>>, vector<1x8x32xbf16>
    %178 = vector.shape_cast %177 : vector<1x8x32xbf16> to vector<8x32xbf16>
    %179 = vector.shape_cast %176 : vector<8x32xbf16> to vector<1x8x32xbf16>
    tpu.vector_store %arg10[%c6_60, %c0_61, %c0_62], %179 {strides = array<i32>} : memref<8x8x32xbf16, #tpu.memory_space<vmem>>, vector<1x8x32xbf16>,
    %c7 = arith.constant 7 : index
    %c0_63 = arith.constant 0 : index
    %c0_64 = arith.constant 0 : index
    %180 = vector.load %arg9[%c7, %c0_63, %c0_64] : memref<8x8x128xf32, #tpu.memory_space<vmem>>, vector<1x8x128xf32>
    %181 = vector.shape_cast %180 : vector<1x8x128xf32> to vector<8x128xf32>
    %182 = arith.truncf %175 : vector<8x32xf32> to vector<8x32xbf16>
    %cst_65 = arith.constant dense<0.000000e+00> : vector<8x128xf32>
    %183 = tpu.matmul %182, %1, %cst_65 {dimension_numbers = #tpu.dot_dimension_numbers<[1], [0], [0], [1], [0, 0, 1, 1], [], []>} : vector<8x32xbf16>, vector<32x128xbf16>, vector<8x128xf32> -> vector<8x128xf32>
    %184 = arith.addf %181, %183 : vector<8x128xf32>
    %185 = arith.negf %184 : vector<8x128xf32>
    %186 = math.exp %185 : vector<8x128xf32>
    %cst_66 = arith.constant 1.000000e+00 : f32
    %187 = vector.broadcast %cst_66 : f32 to vector<8x128xf32>
    %188 = arith.addf %187, %186 : vector<8x128xf32>
    %189 = arith.divf %187, %188 : vector<8x128xf32>
    %190 = math.tanh %184 : vector<8x128xf32>
    %191 = vector.extract_strided_slice %189 {offsets = [0, 0], sizes = [8, 32], strides = [1, 1]} : vector<8x128xf32> to vector<8x32xf32>
    %192 = vector.extract_strided_slice %189 {offsets = [0, 32], sizes = [8, 32], strides = [1, 1]} : vector<8x128xf32> to vector<8x32xf32>
    %193 = vector.extract_strided_slice %190 {offsets = [0, 64], sizes = [8, 32], strides = [1, 1]} : vector<8x128xf32> to vector<8x32xf32>
    %194 = vector.extract_strided_slice %189 {offsets = [0, 96], sizes = [8, 32], strides = [1, 1]} : vector<8x128xf32> to vector<8x32xf32>
    %195 = arith.mulf %192, %173 : vector<8x32xf32>
    %196 = arith.mulf %191, %193 : vector<8x32xf32>
    %197 = arith.addf %195, %196 : vector<8x32xf32>
    %198 = math.tanh %197 : vector<8x32xf32>
    %199 = arith.mulf %194, %198 : vector<8x32xf32>
    %200 = arith.truncf %199 : vector<8x32xf32> to vector<8x32xbf16>
    %c7_67 = arith.constant 7 : index
    %c0_68 = arith.constant 0 : index
    %c0_69 = arith.constant 0 : index
    %201 = vector.load %arg10[%c7_67, %c0_68, %c0_69] : memref<8x8x32xbf16, #tpu.memory_space<vmem>>, vector<1x8x32xbf16>
    %202 = vector.shape_cast %201 : vector<1x8x32xbf16> to vector<8x32xbf16>
    %203 = vector.shape_cast %200 : vector<8x32xbf16> to vector<1x8x32xbf16>
    tpu.vector_store %arg10[%c7_67, %c0_68, %c0_69], %203 {strides = array<i32>} : memref<8x8x32xbf16, #tpu.memory_space<vmem>>, vector<1x8x32xbf16>,
    %c0_70 = arith.constant 0 : index
    %c0_71 = arith.constant 0 : index
    %204 = vector.load %arg5[%c0_70, %c0_71] : memref<32x128xbf16, #tpu.memory_space<vmem>>, vector<32x128xbf16>
    %c0_72 = arith.constant 0 : index
    %c0_73 = arith.constant 0 : index
    %205 = vector.load %arg6[%c0_72, %c0_73] : memref<32x128xbf16, #tpu.memory_space<vmem>>, vector<32x128xbf16>
    %c0_74 = arith.constant 0 : index
    %c0_75 = arith.constant 0 : index
    %206 = vector.load %arg7[%c0_74, %c0_75] : memref<1x128xf32, #tpu.memory_space<vmem>>, vector<1x128xf32>
    %c0_76 = arith.constant 0 : index
    %c0_77 = arith.constant 0 : index
    %c0_78 = arith.constant 0 : index
    %207 = vector.load %arg10[%c0_76, %c0_77, %c0_78] : memref<8x8x32xbf16, #tpu.memory_space<vmem>>, vector<8x8x32xbf16>
    %208 = vector.shape_cast %207 : vector<8x8x32xbf16> to vector<64x32xbf16>
    %cst_79 = arith.constant dense<0.000000e+00> : vector<64x128xf32>
    %209 = tpu.matmul %208, %204, %cst_79 {dimension_numbers = #tpu.dot_dimension_numbers<[1], [0], [0], [1], [0, 0, 1, 1], [], []>} : vector<64x32xbf16>, vector<32x128xbf16>, vector<64x128xf32> -> vector<64x128xf32>
    %210 = vector.broadcast %206 : vector<1x128xf32> to vector<64x128xf32>
    %211 = arith.addf %209, %210 : vector<64x128xf32>
    %212 = vector.shape_cast %211 : vector<64x128xf32> to vector<8x8x128xf32>
    %c0_80 = arith.constant 0 : index
    %c0_81 = arith.constant 0 : index
    %c0_82 = arith.constant 0 : index
    %213 = vector.load %arg9[%c0_80, %c0_81, %c0_82] : memref<8x8x128xf32, #tpu.memory_space<vmem>>, vector<8x8x128xf32>
    tpu.vector_store %arg9[%c0_80, %c0_81, %c0_82], %212 {strides = array<i32>} : memref<8x8x128xf32, #tpu.memory_space<vmem>>, vector<8x8x128xf32>,
    %cst_83 = arith.constant 0.000000e+00 : f32
    %214 = vector.broadcast %cst_83 : f32 to vector<8x32xf32>
    %cst_84 = arith.constant 0.000000e+00 : f32
    %215 = vector.broadcast %cst_84 : f32 to vector<8x32xf32>
    %c0_85 = arith.constant 0 : index
    %c0_86 = arith.constant 0 : index
    %c0_87 = arith.constant 0 : index
    %216 = vector.load %arg9[%c0_85, %c0_86, %c0_87] : memref<8x8x128xf32, #tpu.memory_space<vmem>>, vector<1x8x128xf32>
    %217 = vector.shape_cast %216 : vector<1x8x128xf32> to vector<8x128xf32>
    %218 = arith.truncf %214 : vector<8x32xf32> to vector<8x32xbf16>
    %cst_88 = arith.constant dense<0.000000e+00> : vector<8x128xf32>
    %219 = tpu.matmul %218, %205, %cst_88 {dimension_numbers = #tpu.dot_dimension_numbers<[1], [0], [0], [1], [0, 0, 1, 1], [], []>} : vector<8x32xbf16>, vector<32x128xbf16>, vector<8x128xf32> -> vector<8x128xf32>
    %220 = arith.addf %217, %219 : vector<8x128xf32>
    %221 = arith.negf %220 : vector<8x128xf32>
    %222 = math.exp %221 : vector<8x128xf32>
    %cst_89 = arith.constant 1.000000e+00 : f32
    %223 = vector.broadcast %cst_89 : f32 to vector<8x128xf32>
    %224 = arith.addf %223, %222 : vector<8x128xf32>
    %225 = arith.divf %223, %224 : vector<8x128xf32>
    %226 = math.tanh %220 : vector<8x128xf32>
    %227 = vector.extract_strided_slice %225 {offsets = [0, 0], sizes = [8, 32], strides = [1, 1]} : vector<8x128xf32> to vector<8x32xf32>
    %228 = vector.extract_strided_slice %225 {offsets = [0, 32], sizes = [8, 32], strides = [1, 1]} : vector<8x128xf32> to vector<8x32xf32>
    %229 = vector.extract_strided_slice %226 {offsets = [0, 64], sizes = [8, 32], strides = [1, 1]} : vector<8x128xf32> to vector<8x32xf32>
    %230 = vector.extract_strided_slice %225 {offsets = [0, 96], sizes = [8, 32], strides = [1, 1]} : vector<8x128xf32> to vector<8x32xf32>
    %231 = arith.mulf %228, %215 : vector<8x32xf32>
    %232 = arith.mulf %227, %229 : vector<8x32xf32>
    %233 = arith.addf %231, %232 : vector<8x32xf32>
    %234 = math.tanh %233 : vector<8x32xf32>
    %235 = arith.mulf %230, %234 : vector<8x32xf32>
    %236 = arith.truncf %235 : vector<8x32xf32> to vector<8x32xbf16>
    %c0_90 = arith.constant 0 : index
    %c0_91 = arith.constant 0 : index
    %c0_92 = arith.constant 0 : index
    %237 = vector.load %arg10[%c0_90, %c0_91, %c0_92] : memref<8x8x32xbf16, #tpu.memory_space<vmem>>, vector<1x8x32xbf16>
    %238 = vector.shape_cast %237 : vector<1x8x32xbf16> to vector<8x32xbf16>
    %239 = vector.shape_cast %236 : vector<8x32xbf16> to vector<1x8x32xbf16>
    tpu.vector_store %arg10[%c0_90, %c0_91, %c0_92], %239 {strides = array<i32>} : memref<8x8x32xbf16, #tpu.memory_space<vmem>>, vector<1x8x32xbf16>,
    %c1_93 = arith.constant 1 : index
    %c0_94 = arith.constant 0 : index
    %c0_95 = arith.constant 0 : index
    %240 = vector.load %arg9[%c1_93, %c0_94, %c0_95] : memref<8x8x128xf32, #tpu.memory_space<vmem>>, vector<1x8x128xf32>
    %241 = vector.shape_cast %240 : vector<1x8x128xf32> to vector<8x128xf32>
    %242 = arith.truncf %235 : vector<8x32xf32> to vector<8x32xbf16>
    %cst_96 = arith.constant dense<0.000000e+00> : vector<8x128xf32>
    %243 = tpu.matmul %242, %205, %cst_96 {dimension_numbers = #tpu.dot_dimension_numbers<[1], [0], [0], [1], [0, 0, 1, 1], [], []>} : vector<8x32xbf16>, vector<32x128xbf16>, vector<8x128xf32> -> vector<8x128xf32>
    %244 = arith.addf %241, %243 : vector<8x128xf32>
    %245 = arith.negf %244 : vector<8x128xf32>
    %246 = math.exp %245 : vector<8x128xf32>
    %cst_97 = arith.constant 1.000000e+00 : f32
    %247 = vector.broadcast %cst_97 : f32 to vector<8x128xf32>
    %248 = arith.addf %247, %246 : vector<8x128xf32>
    %249 = arith.divf %247, %248 : vector<8x128xf32>
    %250 = math.tanh %244 : vector<8x128xf32>
    %251 = vector.extract_strided_slice %249 {offsets = [0, 0], sizes = [8, 32], strides = [1, 1]} : vector<8x128xf32> to vector<8x32xf32>
    %252 = vector.extract_strided_slice %249 {offsets = [0, 32], sizes = [8, 32], strides = [1, 1]} : vector<8x128xf32> to vector<8x32xf32>
    %253 = vector.extract_strided_slice %250 {offsets = [0, 64], sizes = [8, 32], strides = [1, 1]} : vector<8x128xf32> to vector<8x32xf32>
    %254 = vector.extract_strided_slice %249 {offsets = [0, 96], sizes = [8, 32], strides = [1, 1]} : vector<8x128xf32> to vector<8x32xf32>
    %255 = arith.mulf %252, %233 : vector<8x32xf32>
    %256 = arith.mulf %251, %253 : vector<8x32xf32>
    %257 = arith.addf %255, %256 : vector<8x32xf32>
    %258 = math.tanh %257 : vector<8x32xf32>
    %259 = arith.mulf %254, %258 : vector<8x32xf32>
    %260 = arith.truncf %259 : vector<8x32xf32> to vector<8x32xbf16>
    %c1_98 = arith.constant 1 : index
    %c0_99 = arith.constant 0 : index
    %c0_100 = arith.constant 0 : index
    %261 = vector.load %arg10[%c1_98, %c0_99, %c0_100] : memref<8x8x32xbf16, #tpu.memory_space<vmem>>, vector<1x8x32xbf16>
    %262 = vector.shape_cast %261 : vector<1x8x32xbf16> to vector<8x32xbf16>
    %263 = vector.shape_cast %260 : vector<8x32xbf16> to vector<1x8x32xbf16>
    tpu.vector_store %arg10[%c1_98, %c0_99, %c0_100], %263 {strides = array<i32>} : memref<8x8x32xbf16, #tpu.memory_space<vmem>>, vector<1x8x32xbf16>,
    %c2_101 = arith.constant 2 : index
    %c0_102 = arith.constant 0 : index
    %c0_103 = arith.constant 0 : index
    %264 = vector.load %arg9[%c2_101, %c0_102, %c0_103] : memref<8x8x128xf32, #tpu.memory_space<vmem>>, vector<1x8x128xf32>
    %265 = vector.shape_cast %264 : vector<1x8x128xf32> to vector<8x128xf32>
    %266 = arith.truncf %259 : vector<8x32xf32> to vector<8x32xbf16>
    %cst_104 = arith.constant dense<0.000000e+00> : vector<8x128xf32>
    %267 = tpu.matmul %266, %205, %cst_104 {dimension_numbers = #tpu.dot_dimension_numbers<[1], [0], [0], [1], [0, 0, 1, 1], [], []>} : vector<8x32xbf16>, vector<32x128xbf16>, vector<8x128xf32> -> vector<8x128xf32>
    %268 = arith.addf %265, %267 : vector<8x128xf32>
    %269 = arith.negf %268 : vector<8x128xf32>
    %270 = math.exp %269 : vector<8x128xf32>
    %cst_105 = arith.constant 1.000000e+00 : f32
    %271 = vector.broadcast %cst_105 : f32 to vector<8x128xf32>
    %272 = arith.addf %271, %270 : vector<8x128xf32>
    %273 = arith.divf %271, %272 : vector<8x128xf32>
    %274 = math.tanh %268 : vector<8x128xf32>
    %275 = vector.extract_strided_slice %273 {offsets = [0, 0], sizes = [8, 32], strides = [1, 1]} : vector<8x128xf32> to vector<8x32xf32>
    %276 = vector.extract_strided_slice %273 {offsets = [0, 32], sizes = [8, 32], strides = [1, 1]} : vector<8x128xf32> to vector<8x32xf32>
    %277 = vector.extract_strided_slice %274 {offsets = [0, 64], sizes = [8, 32], strides = [1, 1]} : vector<8x128xf32> to vector<8x32xf32>
    %278 = vector.extract_strided_slice %273 {offsets = [0, 96], sizes = [8, 32], strides = [1, 1]} : vector<8x128xf32> to vector<8x32xf32>
    %279 = arith.mulf %276, %257 : vector<8x32xf32>
    %280 = arith.mulf %275, %277 : vector<8x32xf32>
    %281 = arith.addf %279, %280 : vector<8x32xf32>
    %282 = math.tanh %281 : vector<8x32xf32>
    %283 = arith.mulf %278, %282 : vector<8x32xf32>
    %284 = arith.truncf %283 : vector<8x32xf32> to vector<8x32xbf16>
    %c2_106 = arith.constant 2 : index
    %c0_107 = arith.constant 0 : index
    %c0_108 = arith.constant 0 : index
    %285 = vector.load %arg10[%c2_106, %c0_107, %c0_108] : memref<8x8x32xbf16, #tpu.memory_space<vmem>>, vector<1x8x32xbf16>
    %286 = vector.shape_cast %285 : vector<1x8x32xbf16> to vector<8x32xbf16>
    %287 = vector.shape_cast %284 : vector<8x32xbf16> to vector<1x8x32xbf16>
    tpu.vector_store %arg10[%c2_106, %c0_107, %c0_108], %287 {strides = array<i32>} : memref<8x8x32xbf16, #tpu.memory_space<vmem>>, vector<1x8x32xbf16>,
    %c3_109 = arith.constant 3 : index
    %c0_110 = arith.constant 0 : index
    %c0_111 = arith.constant 0 : index
    %288 = vector.load %arg9[%c3_109, %c0_110, %c0_111] : memref<8x8x128xf32, #tpu.memory_space<vmem>>, vector<1x8x128xf32>
    %289 = vector.shape_cast %288 : vector<1x8x128xf32> to vector<8x128xf32>
    %290 = arith.truncf %283 : vector<8x32xf32> to vector<8x32xbf16>
    %cst_112 = arith.constant dense<0.000000e+00> : vector<8x128xf32>
    %291 = tpu.matmul %290, %205, %cst_112 {dimension_numbers = #tpu.dot_dimension_numbers<[1], [0], [0], [1], [0, 0, 1, 1], [], []>} : vector<8x32xbf16>, vector<32x128xbf16>, vector<8x128xf32> -> vector<8x128xf32>
    %292 = arith.addf %289, %291 : vector<8x128xf32>
    %293 = arith.negf %292 : vector<8x128xf32>
    %294 = math.exp %293 : vector<8x128xf32>
    %cst_113 = arith.constant 1.000000e+00 : f32
    %295 = vector.broadcast %cst_113 : f32 to vector<8x128xf32>
    %296 = arith.addf %295, %294 : vector<8x128xf32>
    %297 = arith.divf %295, %296 : vector<8x128xf32>
    %298 = math.tanh %292 : vector<8x128xf32>
    %299 = vector.extract_strided_slice %297 {offsets = [0, 0], sizes = [8, 32], strides = [1, 1]} : vector<8x128xf32> to vector<8x32xf32>
    %300 = vector.extract_strided_slice %297 {offsets = [0, 32], sizes = [8, 32], strides = [1, 1]} : vector<8x128xf32> to vector<8x32xf32>
    %301 = vector.extract_strided_slice %298 {offsets = [0, 64], sizes = [8, 32], strides = [1, 1]} : vector<8x128xf32> to vector<8x32xf32>
    %302 = vector.extract_strided_slice %297 {offsets = [0, 96], sizes = [8, 32], strides = [1, 1]} : vector<8x128xf32> to vector<8x32xf32>
    %303 = arith.mulf %300, %281 : vector<8x32xf32>
    %304 = arith.mulf %299, %301 : vector<8x32xf32>
    %305 = arith.addf %303, %304 : vector<8x32xf32>
    %306 = math.tanh %305 : vector<8x32xf32>
    %307 = arith.mulf %302, %306 : vector<8x32xf32>
    %308 = arith.truncf %307 : vector<8x32xf32> to vector<8x32xbf16>
    %c3_114 = arith.constant 3 : index
    %c0_115 = arith.constant 0 : index
    %c0_116 = arith.constant 0 : index
    %309 = vector.load %arg10[%c3_114, %c0_115, %c0_116] : memref<8x8x32xbf16, #tpu.memory_space<vmem>>, vector<1x8x32xbf16>
    %310 = vector.shape_cast %309 : vector<1x8x32xbf16> to vector<8x32xbf16>
    %311 = vector.shape_cast %308 : vector<8x32xbf16> to vector<1x8x32xbf16>
    tpu.vector_store %arg10[%c3_114, %c0_115, %c0_116], %311 {strides = array<i32>} : memref<8x8x32xbf16, #tpu.memory_space<vmem>>, vector<1x8x32xbf16>,
    %c4_117 = arith.constant 4 : index
    %c0_118 = arith.constant 0 : index
    %c0_119 = arith.constant 0 : index
    %312 = vector.load %arg9[%c4_117, %c0_118, %c0_119] : memref<8x8x128xf32, #tpu.memory_space<vmem>>, vector<1x8x128xf32>
    %313 = vector.shape_cast %312 : vector<1x8x128xf32> to vector<8x128xf32>
    %314 = arith.truncf %307 : vector<8x32xf32> to vector<8x32xbf16>
    %cst_120 = arith.constant dense<0.000000e+00> : vector<8x128xf32>
    %315 = tpu.matmul %314, %205, %cst_120 {dimension_numbers = #tpu.dot_dimension_numbers<[1], [0], [0], [1], [0, 0, 1, 1], [], []>} : vector<8x32xbf16>, vector<32x128xbf16>, vector<8x128xf32> -> vector<8x128xf32>
    %316 = arith.addf %313, %315 : vector<8x128xf32>
    %317 = arith.negf %316 : vector<8x128xf32>
    %318 = math.exp %317 : vector<8x128xf32>
    %cst_121 = arith.constant 1.000000e+00 : f32
    %319 = vector.broadcast %cst_121 : f32 to vector<8x128xf32>
    %320 = arith.addf %319, %318 : vector<8x128xf32>
    %321 = arith.divf %319, %320 : vector<8x128xf32>
    %322 = math.tanh %316 : vector<8x128xf32>
    %323 = vector.extract_strided_slice %321 {offsets = [0, 0], sizes = [8, 32], strides = [1, 1]} : vector<8x128xf32> to vector<8x32xf32>
    %324 = vector.extract_strided_slice %321 {offsets = [0, 32], sizes = [8, 32], strides = [1, 1]} : vector<8x128xf32> to vector<8x32xf32>
    %325 = vector.extract_strided_slice %322 {offsets = [0, 64], sizes = [8, 32], strides = [1, 1]} : vector<8x128xf32> to vector<8x32xf32>
    %326 = vector.extract_strided_slice %321 {offsets = [0, 96], sizes = [8, 32], strides = [1, 1]} : vector<8x128xf32> to vector<8x32xf32>
    %327 = arith.mulf %324, %305 : vector<8x32xf32>
    %328 = arith.mulf %323, %325 : vector<8x32xf32>
    %329 = arith.addf %327, %328 : vector<8x32xf32>
    %330 = math.tanh %329 : vector<8x32xf32>
    %331 = arith.mulf %326, %330 : vector<8x32xf32>
    %332 = arith.truncf %331 : vector<8x32xf32> to vector<8x32xbf16>
    %c4_122 = arith.constant 4 : index
    %c0_123 = arith.constant 0 : index
    %c0_124 = arith.constant 0 : index
    %333 = vector.load %arg10[%c4_122, %c0_123, %c0_124] : memref<8x8x32xbf16, #tpu.memory_space<vmem>>, vector<1x8x32xbf16>
    %334 = vector.shape_cast %333 : vector<1x8x32xbf16> to vector<8x32xbf16>
    %335 = vector.shape_cast %332 : vector<8x32xbf16> to vector<1x8x32xbf16>
    tpu.vector_store %arg10[%c4_122, %c0_123, %c0_124], %335 {strides = array<i32>} : memref<8x8x32xbf16, #tpu.memory_space<vmem>>, vector<1x8x32xbf16>,
    %c5_125 = arith.constant 5 : index
    %c0_126 = arith.constant 0 : index
    %c0_127 = arith.constant 0 : index
    %336 = vector.load %arg9[%c5_125, %c0_126, %c0_127] : memref<8x8x128xf32, #tpu.memory_space<vmem>>, vector<1x8x128xf32>
    %337 = vector.shape_cast %336 : vector<1x8x128xf32> to vector<8x128xf32>
    %338 = arith.truncf %331 : vector<8x32xf32> to vector<8x32xbf16>
    %cst_128 = arith.constant dense<0.000000e+00> : vector<8x128xf32>
    %339 = tpu.matmul %338, %205, %cst_128 {dimension_numbers = #tpu.dot_dimension_numbers<[1], [0], [0], [1], [0, 0, 1, 1], [], []>} : vector<8x32xbf16>, vector<32x128xbf16>, vector<8x128xf32> -> vector<8x128xf32>
    %340 = arith.addf %337, %339 : vector<8x128xf32>
    %341 = arith.negf %340 : vector<8x128xf32>
    %342 = math.exp %341 : vector<8x128xf32>
    %cst_129 = arith.constant 1.000000e+00 : f32
    %343 = vector.broadcast %cst_129 : f32 to vector<8x128xf32>
    %344 = arith.addf %343, %342 : vector<8x128xf32>
    %345 = arith.divf %343, %344 : vector<8x128xf32>
    %346 = math.tanh %340 : vector<8x128xf32>
    %347 = vector.extract_strided_slice %345 {offsets = [0, 0], sizes = [8, 32], strides = [1, 1]} : vector<8x128xf32> to vector<8x32xf32>
    %348 = vector.extract_strided_slice %345 {offsets = [0, 32], sizes = [8, 32], strides = [1, 1]} : vector<8x128xf32> to vector<8x32xf32>
    %349 = vector.extract_strided_slice %346 {offsets = [0, 64], sizes = [8, 32], strides = [1, 1]} : vector<8x128xf32> to vector<8x32xf32>
    %350 = vector.extract_strided_slice %345 {offsets = [0, 96], sizes = [8, 32], strides = [1, 1]} : vector<8x128xf32> to vector<8x32xf32>
    %351 = arith.mulf %348, %329 : vector<8x32xf32>
    %352 = arith.mulf %347, %349 : vector<8x32xf32>
    %353 = arith.addf %351, %352 : vector<8x32xf32>
    %354 = math.tanh %353 : vector<8x32xf32>
    %355 = arith.mulf %350, %354 : vector<8x32xf32>
    %356 = arith.truncf %355 : vector<8x32xf32> to vector<8x32xbf16>
    %c5_130 = arith.constant 5 : index
    %c0_131 = arith.constant 0 : index
    %c0_132 = arith.constant 0 : index
    %357 = vector.load %arg10[%c5_130, %c0_131, %c0_132] : memref<8x8x32xbf16, #tpu.memory_space<vmem>>, vector<1x8x32xbf16>
    %358 = vector.shape_cast %357 : vector<1x8x32xbf16> to vector<8x32xbf16>
    %359 = vector.shape_cast %356 : vector<8x32xbf16> to vector<1x8x32xbf16>
    tpu.vector_store %arg10[%c5_130, %c0_131, %c0_132], %359 {strides = array<i32>} : memref<8x8x32xbf16, #tpu.memory_space<vmem>>, vector<1x8x32xbf16>,
    %c6_133 = arith.constant 6 : index
    %c0_134 = arith.constant 0 : index
    %c0_135 = arith.constant 0 : index
    %360 = vector.load %arg9[%c6_133, %c0_134, %c0_135] : memref<8x8x128xf32, #tpu.memory_space<vmem>>, vector<1x8x128xf32>
    %361 = vector.shape_cast %360 : vector<1x8x128xf32> to vector<8x128xf32>
    %362 = arith.truncf %355 : vector<8x32xf32> to vector<8x32xbf16>
    %cst_136 = arith.constant dense<0.000000e+00> : vector<8x128xf32>
    %363 = tpu.matmul %362, %205, %cst_136 {dimension_numbers = #tpu.dot_dimension_numbers<[1], [0], [0], [1], [0, 0, 1, 1], [], []>} : vector<8x32xbf16>, vector<32x128xbf16>, vector<8x128xf32> -> vector<8x128xf32>
    %364 = arith.addf %361, %363 : vector<8x128xf32>
    %365 = arith.negf %364 : vector<8x128xf32>
    %366 = math.exp %365 : vector<8x128xf32>
    %cst_137 = arith.constant 1.000000e+00 : f32
    %367 = vector.broadcast %cst_137 : f32 to vector<8x128xf32>
    %368 = arith.addf %367, %366 : vector<8x128xf32>
    %369 = arith.divf %367, %368 : vector<8x128xf32>
    %370 = math.tanh %364 : vector<8x128xf32>
    %371 = vector.extract_strided_slice %369 {offsets = [0, 0], sizes = [8, 32], strides = [1, 1]} : vector<8x128xf32> to vector<8x32xf32>
    %372 = vector.extract_strided_slice %369 {offsets = [0, 32], sizes = [8, 32], strides = [1, 1]} : vector<8x128xf32> to vector<8x32xf32>
    %373 = vector.extract_strided_slice %370 {offsets = [0, 64], sizes = [8, 32], strides = [1, 1]} : vector<8x128xf32> to vector<8x32xf32>
    %374 = vector.extract_strided_slice %369 {offsets = [0, 96], sizes = [8, 32], strides = [1, 1]} : vector<8x128xf32> to vector<8x32xf32>
    %375 = arith.mulf %372, %353 : vector<8x32xf32>
    %376 = arith.mulf %371, %373 : vector<8x32xf32>
    %377 = arith.addf %375, %376 : vector<8x32xf32>
    %378 = math.tanh %377 : vector<8x32xf32>
    %379 = arith.mulf %374, %378 : vector<8x32xf32>
    %380 = arith.truncf %379 : vector<8x32xf32> to vector<8x32xbf16>
    %c6_138 = arith.constant 6 : index
    %c0_139 = arith.constant 0 : index
    %c0_140 = arith.constant 0 : index
    %381 = vector.load %arg10[%c6_138, %c0_139, %c0_140] : memref<8x8x32xbf16, #tpu.memory_space<vmem>>, vector<1x8x32xbf16>
    %382 = vector.shape_cast %381 : vector<1x8x32xbf16> to vector<8x32xbf16>
    %383 = vector.shape_cast %380 : vector<8x32xbf16> to vector<1x8x32xbf16>
    tpu.vector_store %arg10[%c6_138, %c0_139, %c0_140], %383 {strides = array<i32>} : memref<8x8x32xbf16, #tpu.memory_space<vmem>>, vector<1x8x32xbf16>,
    %c7_141 = arith.constant 7 : index
    %c0_142 = arith.constant 0 : index
    %c0_143 = arith.constant 0 : index
    %384 = vector.load %arg9[%c7_141, %c0_142, %c0_143] : memref<8x8x128xf32, #tpu.memory_space<vmem>>, vector<1x8x128xf32>
    %385 = vector.shape_cast %384 : vector<1x8x128xf32> to vector<8x128xf32>
    %386 = arith.truncf %379 : vector<8x32xf32> to vector<8x32xbf16>
    %cst_144 = arith.constant dense<0.000000e+00> : vector<8x128xf32>
    %387 = tpu.matmul %386, %205, %cst_144 {dimension_numbers = #tpu.dot_dimension_numbers<[1], [0], [0], [1], [0, 0, 1, 1], [], []>} : vector<8x32xbf16>, vector<32x128xbf16>, vector<8x128xf32> -> vector<8x128xf32>
    %388 = arith.addf %385, %387 : vector<8x128xf32>
    %389 = arith.negf %388 : vector<8x128xf32>
    %390 = math.exp %389 : vector<8x128xf32>
    %cst_145 = arith.constant 1.000000e+00 : f32
    %391 = vector.broadcast %cst_145 : f32 to vector<8x128xf32>
    %392 = arith.addf %391, %390 : vector<8x128xf32>
    %393 = arith.divf %391, %392 : vector<8x128xf32>
    %394 = math.tanh %388 : vector<8x128xf32>
    %395 = vector.extract_strided_slice %393 {offsets = [0, 0], sizes = [8, 32], strides = [1, 1]} : vector<8x128xf32> to vector<8x32xf32>
    %396 = vector.extract_strided_slice %393 {offsets = [0, 32], sizes = [8, 32], strides = [1, 1]} : vector<8x128xf32> to vector<8x32xf32>
    %397 = vector.extract_strided_slice %394 {offsets = [0, 64], sizes = [8, 32], strides = [1, 1]} : vector<8x128xf32> to vector<8x32xf32>
    %398 = vector.extract_strided_slice %393 {offsets = [0, 96], sizes = [8, 32], strides = [1, 1]} : vector<8x128xf32> to vector<8x32xf32>
    %399 = arith.mulf %396, %377 : vector<8x32xf32>
    %400 = arith.mulf %395, %397 : vector<8x32xf32>
    %401 = arith.addf %399, %400 : vector<8x32xf32>
    %402 = math.tanh %401 : vector<8x32xf32>
    %403 = arith.mulf %398, %402 : vector<8x32xf32>
    %404 = arith.truncf %403 : vector<8x32xf32> to vector<8x32xbf16>
    %c7_146 = arith.constant 7 : index
    %c0_147 = arith.constant 0 : index
    %c0_148 = arith.constant 0 : index
    %405 = vector.load %arg10[%c7_146, %c0_147, %c0_148] : memref<8x8x32xbf16, #tpu.memory_space<vmem>>, vector<1x8x32xbf16>
    %406 = vector.shape_cast %405 : vector<1x8x32xbf16> to vector<8x32xbf16>
    %407 = vector.shape_cast %404 : vector<8x32xbf16> to vector<1x8x32xbf16>
    tpu.vector_store %arg10[%c7_146, %c0_147, %c0_148], %407 {strides = array<i32>} : memref<8x8x32xbf16, #tpu.memory_space<vmem>>, vector<1x8x32xbf16>,
    %c0_149 = arith.constant 0 : index
    %c0_150 = arith.constant 0 : index
    %c0_151 = arith.constant 0 : index
    %408 = vector.load %arg1[%c0_149, %c0_150, %c0_151] : memref<8x8x1xf32, #tpu.memory_space<vmem>>, vector<8x8x1xf32>
    %c0_152 = arith.constant 0 : index
    %c0_153 = arith.constant 0 : index
    %c0_154 = arith.constant 0 : index
    %409 = vector.load %arg10[%c0_152, %c0_153, %c0_154] : memref<8x8x32xbf16, #tpu.memory_space<vmem>>, vector<8x8x32xbf16>
    %410 = arith.extf %409 : vector<8x8x32xbf16> to vector<8x8x32xf32>
    %411 = vector.broadcast %408 : vector<8x8x1xf32> to vector<8x8x32xf32>
    %412 = arith.mulf %410, %411 : vector<8x8x32xf32>
    %cst_155 = arith.constant dense<0.000000e+00> : vector<8x32xf32>
    %413 = vector.multi_reduction <add>, %412, %cst_155 [0] : vector<8x8x32xf32> to vector<8x32xf32>
    %cst_156 = arith.constant dense<0.000000e+00> : vector<8x1xf32>
    %414 = vector.multi_reduction <add>, %408, %cst_156 [0] : vector<8x8x1xf32> to vector<8x1xf32>
    %415 = vector.broadcast %414 : vector<8x1xf32> to vector<8x32xf32>
    %416 = arith.divf %413, %415 : vector<8x32xf32>
    %c0_157 = arith.constant 0 : index
    %c0_158 = arith.constant 0 : index
    %417 = vector.load %arg8[%c0_157, %c0_158] : memref<8x32xf32, #tpu.memory_space<vmem>>, vector<8x32xf32>
    tpu.vector_store %arg8[%c0_157, %c0_158], %416 {strides = array<i32>} : memref<8x32xf32, #tpu.memory_space<vmem>>, vector<8x32xf32>,
    return
  }
}

</mosaic_0001>

<bundles_post_ra>
// kernel: lstm_model_forward.1
= control target key start
LH: loop header
LB: loop body
LE: loop exit
PB: predicated region body
PF: predicated region fallthrough
CT: control target
= control target key end

     0   :  { %v2182_v0 = vmov 0.0   ;;  %vm2183_vm0 = vmmov 0   ;;  %vm77_vm1 = vcmask 130048   ;;  %v2184_v3 = vmov 0   ;;  %s2185_s15 = smov 64   ;;  %s2658_s2 = inlined_call_operand.vmem [shape: bf16[16,128], index: 2, kind: input, shape index: {}]   ;;  %s2659_s3 = inlined_call_operand.vmem [shape: bf16[32,128], index: 3, kind: input, shape index: {}]   ;;  %s2660_s0 = inlined_call_operand.vmem [shape: bf16[8,8,16], index: 0, kind: input, shape index: {}]   ;;  %s2661_s4 = inlined_call_operand.vmem [shape: f32[1,128], index: 4, kind: input, shape index: {}]   ;;  %s2662_s5 = inlined_call_operand.vmem [shape: bf16[32,128], index: 5, kind: input, shape index: {}]   ;;  %s2663_s6 = inlined_call_operand.vmem [shape: bf16[32,128], index: 6, kind: input, shape index: {}]   ;;  %s2664_s7 = inlined_call_operand.vmem [shape: f32[1,128], index: 7, kind: input, shape index: {}]   ;;  %s2665_s1 = inlined_call_operand.vmem [shape: f32[8,8,1], index: 1, kind: input, shape index: {}]   ;;  %s2666_s8 = inlined_call_operand.vmem [shape: f32[8,32], index: 8, kind: output, shape index: {}]  }
   0x1   :  { %1890 = vmatprep.subr.bf16.mxu1 %v2182_v0  ;;  %v2037_v1 = vld [vmem:[%s2658_s2] sm:$0xff]   ;;  %1894 = vmatprep.mubr.msk.bf16.mxu1 %vm2183_vm0, %v2182_v0  ;;  %v2040_v5 = vld [vmem:[%s2660_s0 + $0x8] sm:$0xff]   ;;  %vm176_vm2 = vcmask 261120   ;;  %v2042_v49 = vld [vmem:[%s2660_s0 + $0x10] sm:$0xff]   ;;  %vm252_vm3 = vcmask 257024   ;;  %vm1687_vm4 = vcmask 7168  }
   0x2   :  { %v2241_v2 = vld [vmem:[%s2659_s3] sm:$0xff]   ;;  %2035 = vset.pattern.permute.xlu0 %v2184_v3  ;;  %2036 = vset.pattern.permute.xlu1 %v2184_v3  ;;  %v2257_v6 = vld [vmem:[%s2659_s3 + $0x8] sm:$0xff]   ;;  %v2043_v50 = vld [vmem:[%s2660_s0 + $0x18] sm:$0xff]  }
   0x3   :  { %1880 = vmatprep.subr.bf16.mxu0 %v2037_v1  ;;  %v2039_v4 = vld [vmem:[%s2660_s0] sm:$0xff]   ;;  %1891 = vmatpush3.bf16.msra.mxu1 %v2241_v2 }
   0x4   :  { %1881 = vmatpush3.bf16.msra.mxu0 %v2037_v1  ;;  %1882 = vmatprep.mubr.msk.bf16.mxu0 %vm77_vm1, %v2039_v4  ;;  %v2277_v7 = vld [vmem:[%s2661_s4] ss:$0 sm:$0xff]  ;;  %s2186_s4 = smov 32  }
   0x5   :  { %1892 = vmatprep.subr.bf16.mxu1 %v2182_v0  ;;  %1906 = vmatprep.subr.bf16.mxu0 %v2182_v0 }
   0x7   :  { %1883 = vmatmul.mubr.msk.bf16.vlgmr.msra.gmra.mrb[0].mxu0 %vm77_vm1, %v2040_v5  ;;  %1893 = vmatpush3.bf16.msra.mxu1 %v2257_v6 }
   0x8   :  { %1907 = vmatpush3.bf16.msra.mxu0 %v2241_v2  ;;  %1898 = vmatprep.subr.bf16.mxu1 %v2182_v0 }
   0x9   :  { %1908 = vmatprep.subr.bf16.mxu0 %v2182_v0  ;;  %1886 = vmatprep.mubr.msk.bf16.mxu0 %vm77_vm1, %v2042_v49 }
   0xa   :  { %1895 = vmatmul.mubr.bf16.vlgmr.msra.gmra.mrb[0].mxu1 %v2184_v3 }
   0xb   :  { %1899 = vmatpush3.bf16.msra.mxu1 %v2241_v2  ;;  %1902 = vmatprep.mubr.msk.bf16.mxu1 %vm2183_vm0, %v2182_v0 }
   0xc   :  { %1900 = vmatprep.subr.bf16.mxu1 %v2182_v0  ;;  %1909 = vmatpush3.bf16.msra.mxu0 %v2257_v6 }
   0xd   :  { %1922 = vmatprep.subr.bf16.mxu0 %v2182_v0 }
   0xf   :  { %1901 = vmatpush3.bf16.msra.mxu1 %v2257_v6  ;;  %1887 = vmatmul.mubr.msk.bf16.gmra.mrb[4].mxu0 %vm77_vm1, %v2043_v50 }
  0x10   :  { %1914 = vmatprep.subr.bf16.mxu1 %v2182_v0  ;;  %1910 = vmatprep.mubr.msk.bf16.mxu0 %vm2183_vm0, %v2182_v0 }
  0xda   :  { %v2279_v8 = vpop.f32.mrb[0].mxu0 }
  0xdb   :  { %v124_v9 = vpop.f32.mrb[1].mxu0  ;;  %v133_v60 = vadd.f32 %v2279_v8, %v2277_v7 }
  0xdc   :  { %v125_v10 = vadd.f32 %v2277_v7, %v124_v9  ;;  %v2282_v11 = vpop.f32.mrb[2].mxu0 }
  0xdd   :  { %v127_v12 = vpop.f32.mrb[3].mxu0  ;;  %v214_v13 = vpop.f32.mrb[0].mxu1 }
  0xde   :  { %v220_v14 = vadd.f32 %v214_v13, %v125_v10  ;;  %v1896_v15 = vpop.f32.mrb[1].mxu1  ;;  %v128_v33 = vadd.f32 %v2277_v7, %v127_v12 }
  0xdf   :  { %v217_v16 = vpop.f32.mrb[2].mxu1 }
  0xe0   :  { %2052 = vtanh.f32 %v220_v14  ;;  %v1897_v17 = vpop.f32.mrb[3].mxu1  ;;  %v1727_v19 = vmul.f32 -1.442695, %v220_v14 }
  0xe2   :  { %2054 = vpow2.f32 %v1727_v19  ;;  %v2316_v55 = vpop.f32.mrb[4].mxu0 }
  0xe3   :  { %v2318_v56 = vpop.f32.mrb[5].mxu0 }
  0xe4   :  { %v2320_v57 = vpop.f32.mrb[6].mxu0 }
  0xe5   :  { %v2322_v58 = vpop.f32.mrb[7].mxu0 }
  0xea   :  { %v2053_v18 = vpop.eup %2052 }
  0xeb   :  { %230 = vrot.lane.b32.xlu0 %v2053_v18, %s2185_s15 }
  0xec   :  { %v2055_v20 = vpop.eup %2054 }
  0xed   :  { %v224_v21 = vadd.f32 1.0, %v2055_v20 }
  0xef   :  { %2056 = vrcp.f32 %v224_v21 }
  0xf9   :  { %v2057_v22 = vpop.eup %2056 }
  0xfa   :  { %v228_v25 = vmul.f32 0.0, %v2057_v22 }
 0x15d   :  { %v231_v23 = vpop.permute.xlu0 %230 }
 0x15e   :  { %v233_v24 = vmul.f32 %v2057_v22, %v231_v23  ;;  %v136_v23 = vadd.f32 %v2282_v11, %v2277_v7 }
 0x160   :  { %235 = vrot.lane.b32.xlu0 %v233_v24, %s2186_s4 }
 0x1d2   :  { %v236_v26 = vpop.permute.xlu0 %235 }
 0x1d3   :  { %v238_v27 = vadd.f32 %v236_v26, %v228_v25 }
 0x1d5   :  { %2058 = vtanh.f32 %v238_v27 }
 0x1df   :  { %v2059_v28 = vpop.eup %2058 }
 0x1e0   :  { %241 = vrot.lane.b32.xlu1 %v2059_v28, %s2185_s15 }
 0x252   :  { %v242_v29 = vpop.permute.xlu1 %241 }
 0x253   :  { %v244_v30 = vmul.f32 %v2057_v22, %v242_v29 }
 0x255   :  { %v2287_v31 = vpack.c.bf16 %v244_v30, %v244_v30 }
 0x257   :  { %256 = vrot.lane.b32.xlu1 %v2287_v31, %s2186_s4 }
 0x2c9   :  { %v257_v32 = vpop.permute.xlu1 %256 }
 0x2ca   :  { %1903 = vmatmul.mubr.msk.bf16.vlgmr.msra.gmra.mrb[4].mxu1 %vm176_vm2, %v257_v32 }
 0x2cb   :  { %1915 = vmatpush3.bf16.msra.mxu1 %v2241_v2  ;;  %1918 = vmatprep.mubr.msk.bf16.mxu1 %vm2183_vm0, %v2182_v0 }
 0x2cc   :  { %1916 = vmatprep.subr.bf16.mxu1 %v2182_v0 }
 0x2cf   :  { %1917 = vmatpush3.bf16.msra.mxu1 %v2257_v6 }
 0x2d0   :  { %1930 = vmatprep.subr.bf16.mxu1 %v2182_v0 }
 0x39d   :  { %v295_v34 = vpop.f32.mrb[4].mxu1 }
 0x39e   :  { %v301_v35 = vadd.f32 %v295_v34, %v128_v33  ;;  %v1904_v36 = vpop.f32.mrb[5].mxu1 }
 0x39f   :  { %v298_v37 = vpop.f32.mrb[6].mxu1 }
 0x3a0   :  { %2060 = vtanh.f32 %v301_v35  ;;  %v1905_v38 = vpop.f32.mrb[7].mxu1  ;;  %v1730_v40 = vmul.f32 -1.442695, %v301_v35 }
 0x3a2   :  { %2062 = vpow2.f32 %v1730_v40 }
 0x3aa   :  { %v2061_v39 = vpop.eup %2060 }
 0x3ab   :  { %311 = vrot.lane.b32.xlu0 %v2061_v39, %s2185_s15 }
 0x3ac   :  { %v2063_v41 = vpop.eup %2062 }
 0x3ad   :  { %v305_v42 = vadd.f32 1.0, %v2063_v41 }
 0x3af   :  { %2064 = vrcp.f32 %v305_v42 }
 0x3b9   :  { %v2065_v43 = vpop.eup %2064 }
 0x3ba   :  { %v309_v46 = vmul.f32 %v2065_v43, %v238_v27 }
 0x41d   :  { %v312_v44 = vpop.permute.xlu0 %311 }
 0x41e   :  { %v314_v45 = vmul.f32 %v2065_v43, %v312_v44  ;;  %v141_v44 = vadd.f32 %v2277_v7, %v2318_v56 }
 0x420   :  { %316 = vrot.lane.b32.xlu1 %v314_v45, %s2186_s4 }
 0x492   :  { %v317_v47 = vpop.permute.xlu1 %316 }
 0x493   :  { %v319_v48 = vadd.f32 %v317_v47, %v309_v46 }
 0x495   :  { %2066 = vtanh.f32 %v319_v48 }
 0x49f   :  { %v2067_v51 = vpop.eup %2066 }
 0x4a0   :  { %322 = vrot.lane.b32.xlu0 %v2067_v51, %s2185_s15 }
 0x512   :  { %v323_v52 = vpop.permute.xlu0 %322 }
 0x513   :  { %v325_v53 = vmul.f32 %v2065_v43, %v323_v52 }
 0x515   :  { %v2312_v54 = vpack.c.bf16 %v325_v53, %v325_v53 }
 0x517   :  { %337 = vrot.lane.b32.xlu1 %v2312_v54, %s2186_s4 }
 0x589   :  { %v338_v59 = vpop.permute.xlu1 %337 }
 0x58a   :  { %1911 = vmatmul.mubr.msk.bf16.vlgmr.msra.gmra.mrb[8].mxu0 %vm176_vm2, %v338_v59 }
 0x58b   :  { %1923 = vmatpush3.bf16.msra.mxu0 %v2241_v2  ;;  %1926 = vmatprep.mubr.msk.bf16.mxu0 %vm2183_vm0, %v2182_v0 }
 0x58c   :  { %1924 = vmatprep.subr.bf16.mxu0 %v2182_v0 }
 0x58f   :  { %1925 = vmatpush3.bf16.msra.mxu0 %v2257_v6 }
 0x590   :  { %1938 = vmatprep.subr.bf16.mxu0 %v2182_v0 }
 0x65d   :  { %v376_v61 = vpop.f32.mrb[8].mxu0 }
 0x65e   :  { %v382_v62 = vadd.f32 %v376_v61, %v133_v60  ;;  %v1912_v63 = vpop.f32.mrb[9].mxu0 }
 0x65f   :  { %v379_v1 = vpop.f32.mrb[10].mxu0 }
 0x660   :  { %2068 = vtanh.f32 %v382_v62  ;;  %v1913_v4 = vpop.f32.mrb[11].mxu0  ;;  %v1733_v9 = vmul.f32 -1.442695, %v382_v62 }
 0x662   :  { %2070 = vpow2.f32 %v1733_v9 }
 0x66a   :  { %v2069_v5 = vpop.eup %2068 }
 0x66b   :  { %392 = vrot.lane.b32.xlu0 %v2069_v5, %s2185_s15 }
 0x66c   :  { %v2071_v10 = vpop.eup %2070 }
 0x66d   :  { %v386_v12 = vadd.f32 1.0, %v2071_v10 }
 0x66f   :  { %2072 = vrcp.f32 %v386_v12  ;;  %v144_v12 = vadd.f32 %v2277_v7, %v2322_v58 }
 0x679   :  { %v2073_v13 = vpop.eup %2072 }
 0x67a   :  { %v390_v8 = vmul.f32 %v2073_v13, %v319_v48 }
 0x6dd   :  { %v393_v14 = vpop.permute.xlu0 %392 }
 0x6de   :  { %v395_v15 = vmul.f32 %v2073_v13, %v393_v14 }
 0x6e0   :  { %397 = vrot.lane.b32.xlu1 %v395_v15, %s2186_s4 }
 0x752   :  { %v398_v16 = vpop.permute.xlu1 %397 }
 0x753   :  { %v400_v17 = vadd.f32 %v398_v16, %v390_v8 }
 0x755   :  { %2074 = vtanh.f32 %v400_v17 }
 0x75f   :  { %v2075_v18 = vpop.eup %2074 }
 0x760   :  { %403 = vrot.lane.b32.xlu0 %v2075_v18, %s2185_s15 }
 0x7d2   :  { %v404_v19 = vpop.permute.xlu0 %403 }
 0x7d3   :  { %v406_v20 = vmul.f32 %v2073_v13, %v404_v19 }
 0x7d5   :  { %v2336_v21 = vpack.c.bf16 %v406_v20, %v406_v20 }
 0x7d7   :  { %418 = vrot.lane.b32.xlu1 %v2336_v21, %s2186_s4 }
 0x849   :  { %v419_v22 = vpop.permute.xlu1 %418 }
 0x84a   :  { %1919 = vmatmul.mubr.msk.bf16.vlgmr.msra.gmra.mrb[8].mxu1 %vm176_vm2, %v419_v22 }
 0x84b   :  { %1931 = vmatpush3.bf16.msra.mxu1 %v2241_v2  ;;  %1934 = vmatprep.mubr.msk.bf16.mxu1 %vm2183_vm0, %v2182_v0 }
 0x84c   :  { %1932 = vmatprep.subr.bf16.mxu1 %v2182_v0 }
 0x84f   :  { %1933 = vmatpush3.bf16.msra.mxu1 %v2257_v6 }
 0x850   :  { %1946 = vmatprep.subr.bf16.mxu1 %v2182_v0 }
 0x91d   :  { %v457_v24 = vpop.f32.mrb[8].mxu1 }
 0x91e   :  { %v463_v25 = vadd.f32 %v457_v24, %v136_v23  ;;  %v1920_v26 = vpop.f32.mrb[9].mxu1 }
 0x91f   :  { %v460_v27 = vpop.f32.mrb[10].mxu1 }
 0x920   :  { %2076 = vtanh.f32 %v463_v25  ;;  %v1921_v28 = vpop.f32.mrb[11].mxu1  ;;  %v1736_v30 = vmul.f32 -1.442695, %v463_v25 }
 0x922   :  { %2078 = vpow2.f32 %v1736_v30  ;;  %v149_v30 = vadd.f32 %v2316_v55, %v2277_v7 }
 0x92a   :  { %v2077_v29 = vpop.eup %2076 }
 0x92b   :  { %473 = vrot.lane.b32.xlu0 %v2077_v29, %s2185_s15 }
 0x92c   :  { %v2079_v32 = vpop.eup %2078 }
 0x92d   :  { %v467_v33 = vadd.f32 1.0, %v2079_v32 }
 0x92f   :  { %2080 = vrcp.f32 %v467_v33 }
 0x939   :  { %v2081_v34 = vpop.eup %2080 }
 0x93a   :  { %v471_v11 = vmul.f32 %v2081_v34, %v400_v17 }
 0x99d   :  { %v474_v35 = vpop.permute.xlu0 %473 }
 0x99e   :  { %v476_v36 = vmul.f32 %v2081_v34, %v474_v35 }
 0x9a0   :  { %478 = vrot.lane.b32.xlu1 %v476_v36, %s2186_s4 }
 0xa12   :  { %v479_v37 = vpop.permute.xlu1 %478 }
 0xa13   :  { %v481_v38 = vadd.f32 %v479_v37, %v471_v11 }
 0xa15   :  { %2082 = vtanh.f32 %v481_v38 }
 0xa1f   :  { %v2083_v39 = vpop.eup %2082 }
 0xa20   :  { %484 = vrot.lane.b32.xlu0 %v2083_v39, %s2185_s15 }
 0xa92   :  { %v485_v40 = vpop.permute.xlu0 %484 }
 0xa93   :  { %v487_v41 = vmul.f32 %v2081_v34, %v485_v40 }
 0xa95   :  { %v2352_v42 = vpack.c.bf16 %v487_v41, %v487_v41 }
 0xa97   :  { %499 = vrot.lane.b32.xlu1 %v2352_v42, %s2186_s4 }
 0xb09   :  { %v500_v43 = vpop.permute.xlu1 %499 }
 0xb0a   :  { %1927 = vmatmul.mubr.msk.bf16.vlgmr.msra.gmra.mrb[12].mxu0 %vm176_vm2, %v500_v43 }
 0xb0b   :  { %1939 = vmatpush3.bf16.msra.mxu0 %v2241_v2  ;;  %1942 = vmatprep.mubr.msk.bf16.mxu0 %vm2183_vm0, %v2182_v0 }
 0xb0c   :  { %1940 = vmatprep.subr.bf16.mxu0 %v2182_v0 }
 0xb0f   :  { %1941 = vmatpush3.bf16.msra.mxu0 %v2257_v6 }
 0xbdd   :  { %v538_v45 = vpop.f32.mrb[12].mxu0 }
 0xbde   :  { %v544_v46 = vadd.f32 %v538_v45, %v141_v44  ;;  %v1928_v47 = vpop.f32.mrb[13].mxu0 }
 0xbdf   :  { %v541_v48 = vpop.f32.mrb[14].mxu0 }
 0xbe0   :  { %2084 = vtanh.f32 %v544_v46  ;;  %v1929_v49 = vpop.f32.mrb[15].mxu0  ;;  %v1739_v51 = vmul.f32 -1.442695, %v544_v46  ;;  %v2044_v48 = vld [vmem:[%s2662_s5] sm:$0xff]  }
 0xbe1   :  { %1954 = vmatprep.subr.bf16.mxu0 %v2044_v48 }
 0xbe2   :  { %2086 = vpow2.f32 %v1739_v51 }
 0xbea   :  { %v2085_v50 = vpop.eup %2084 }
 0xbeb   :  { %554 = vrot.lane.b32.xlu0 %v2085_v50, %s2185_s15 }
 0xbec   :  { %v2087_v52 = vpop.eup %2086 }
 0xbed   :  { %v548_v53 = vadd.f32 1.0, %v2087_v52 }
 0xbef   :  { %2088 = vrcp.f32 %v548_v53 }
 0xbf9   :  { %v2089_v59 = vpop.eup %2088 }
 0xbfa   :  { %v552_v56 = vmul.f32 %v2089_v59, %v481_v38 }
 0xc5d   :  { %v555_v60 = vpop.permute.xlu0 %554 }
 0xc5e   :  { %v557_v61 = vmul.f32 %v2089_v59, %v555_v60  ;;  %v2431_v60 = vld [vmem:[%s2663_s6 + $0x8] sm:$0xff]  }
 0xc60   :  { %559 = vrot.lane.b32.xlu1 %v557_v61, %s2186_s4 }
 0xcd2   :  { %v560_v62 = vpop.permute.xlu1 %559 }
 0xcd3   :  { %v562_v63 = vadd.f32 %v560_v62, %v552_v56 }
 0xcd5   :  { %2090 = vtanh.f32 %v562_v63 }
 0xcdf   :  { %v2091_v1 = vpop.eup %2090 }
 0xce0   :  { %565 = vrot.lane.b32.xlu0 %v2091_v1, %s2185_s15 }
 0xd52   :  { %v566_v4 = vpop.permute.xlu0 %565 }
 0xd53   :  { %v568_v5 = vmul.f32 %v2089_v59, %v566_v4 }
 0xd55   :  { %v2367_v9 = vpack.c.bf16 %v568_v5, %v568_v5 }
 0xd57   :  { %580 = vrot.lane.b32.xlu1 %v2367_v9, %s2186_s4 }
 0xdc9   :  { %v581_v10 = vpop.permute.xlu1 %580 }
 0xdca   :  { %1935 = vmatmul.mubr.msk.bf16.vlgmr.msra.gmra.mrb[12].mxu1 %vm176_vm2, %v581_v10 }
 0xdcb   :  { %1947 = vmatpush3.bf16.msra.mxu1 %v2241_v2  ;;  %1950 = vmatprep.mubr.msk.bf16.mxu1 %vm2183_vm0, %v2182_v0 }
 0xdcc   :  { %1948 = vmatprep.subr.bf16.mxu1 %v2182_v0 }
 0xdcf   :  { %1949 = vmatpush3.bf16.msra.mxu1 %v2257_v6 }
 0xdd0   :  { %1966 = vmatprep.subr.bf16.mxu1 %v2182_v0 }
 0xe9d   :  { %v619_v13 = vpop.f32.mrb[12].mxu1 }
 0xe9e   :  { %v625_v14 = vadd.f32 %v619_v13, %v144_v12  ;;  %v1936_v15 = vpop.f32.mrb[13].mxu1 }
 0xe9f   :  { %v622_v8 = vpop.f32.mrb[14].mxu1 }
 0xea0   :  { %2092 = vtanh.f32 %v625_v14  ;;  %v1937_v16 = vpop.f32.mrb[15].mxu1  ;;  %v1742_v2 = vmul.f32 -1.442695, %v625_v14  ;;  %v2460_v14 = vld [vmem:[%s2664_s7] ss:$0 sm:$0xff] }
 0xea2   :  { %2094 = vpow2.f32 %v1742_v2 }
 0xeaa   :  { %v2093_v17 = vpop.eup %2092 }
 0xeab   :  { %635 = vrot.lane.b32.xlu0 %v2093_v17, %s2185_s15 }
 0xeac   :  { %v2095_v18 = vpop.eup %2094 }
 0xead   :  { %v629_v19 = vadd.f32 1.0, %v2095_v18 }
 0xeaf   :  { %2096 = vrcp.f32 %v629_v19 }
 0xeb9   :  { %v2097_v6 = vpop.eup %2096 }
 0xeba   :  { %v633_v58 = vmul.f32 %v2097_v6, %v562_v63 }
 0xf1d   :  { %v636_v20 = vpop.permute.xlu0 %635 }
 0xf1e   :  { %v638_v22 = vmul.f32 %v2097_v6, %v636_v20 }
 0xf20   :  { %640 = vrot.lane.b32.xlu1 %v638_v22, %s2186_s4 }
 0xf92   :  { %v641_v23 = vpop.permute.xlu1 %640 }
 0xf93   :  { %v643_v24 = vadd.f32 %v641_v23, %v633_v58 }
 0xf95   :  { %2098 = vtanh.f32 %v643_v24 }
 0xf9f   :  { %v2099_v25 = vpop.eup %2098 }
 0xfa0   :  { %646 = vrot.lane.b32.xlu0 %v2099_v25, %s2185_s15 }
0x1012   :  { %v647_v26 = vpop.permute.xlu0 %646 }
0x1013   :  { %v649_v27 = vmul.f32 %v2097_v6, %v647_v26 }
0x1015   :  { %v2383_v28 = vpack.c.bf16 %v649_v27, %v649_v27 }
0x1017   :  { %661 = vrot.lane.b32.xlu1 %v2383_v28, %s2186_s4 }
0x1089   :  { %v662_v29 = vpop.permute.xlu1 %661 }
0x108a   :  { %1943 = vmatmul.mubr.msk.bf16.vlgmr.msra.gmra.mrb[16].mxu0 %vm176_vm2, %v662_v29 }
0x108b   :  { %1955 = vmatpush3.bf16.msra.mxu0 %v2044_v48 }
0x115d   :  { %v700_v32 = vpop.f32.mrb[16].mxu0 }
0x115e   :  { %v706_v33 = vadd.f32 %v700_v32, %v149_v30  ;;  %v1944_v34 = vpop.f32.mrb[17].mxu0 }
0x115f   :  { %v703_v35 = vpop.f32.mrb[18].mxu0 }
0x1160   :  { %2100 = vtanh.f32 %v706_v33  ;;  %v1945_v36 = vpop.f32.mrb[19].mxu0  ;;  %v1745_v37 = vmul.f32 -1.442695, %v706_v33 }
0x1162   :  { %2102 = vpow2.f32 %v1745_v37 }
0x116a   :  { %v2101_v11 = vpop.eup %2100 }
0x116b   :  { %716 = vrot.lane.b32.xlu0 %v2101_v11, %s2185_s15 }
0x116c   :  { %v2103_v38 = vpop.eup %2102 }
0x116d   :  { %v710_v39 = vadd.f32 1.0, %v2103_v38 }
0x116f   :  { %2104 = vrcp.f32 %v710_v39 }
0x1179   :  { %v2105_v40 = vpop.eup %2104 }
0x117a   :  { %v714_v55 = vmul.f32 %v2105_v40, %v643_v24 }
0x11dd   :  { %v717_v41 = vpop.permute.xlu0 %716 }
0x11de   :  { %v719_v43 = vmul.f32 %v2105_v40, %v717_v41 }
0x11e0   :  { %721 = vrot.lane.b32.xlu1 %v719_v43, %s2186_s4 }
0x11e4   :  { %249 = vrot.lane.b32.xlu1 %v2287_v31, %s2186_s4  ;;  %v2045_v31 = vld [vmem:[%s2662_s5 + $0x8] sm:$0xff]  }
0x11e5   :  { %1956 = vmatprep.subr.bf16.mxu0 %v2045_v31 }
0x11e6   :  { %1957 = vmatpush3.bf16.msra.mxu0 %v2045_v31 }
0x11e7   :  { %1982 = vmatprep.subr.bf16.mxu0 %v2182_v0 }
0x11e8   :  { %411 = vrot.lane.b32.xlu1 %v2336_v21, %s2186_s4 }
0x1252   :  { %v722_v44 = vpop.permute.xlu1 %721 }
0x1253   :  { %v2396_v45 = vadd.f32 %v722_v44, %v714_v55 }
0x1255   :  { %2106 = vtanh.f32 %v2396_v45 }
0x1256   :  { %v250_v46 = vpop.permute.xlu1 %249 }
0x1257   :  { %253 = vst.msk [vmem:[#allocation3] sm:$0xf] %vm252_vm3, %v250_v46 }
0x125a   :  { %v412_v47 = vpop.permute.xlu1 %411 }
0x125b   :  { %415 = vst.msk [vmem:[#allocation3 + $0x8] sm:$0xf] %vm252_vm3, %v412_v47 }
0x125f   :  { %v2107_v21 = vpop.eup %2106 }
0x1260   :  { %727 = vrot.lane.b32.xlu0 %v2107_v21, %s2185_s15 }
0x1264   :  { %330 = vrot.lane.b32.xlu0 %v2312_v54, %s2186_s4 }
0x1268   :  { %492 = vrot.lane.b32.xlu0 %v2352_v42, %s2186_s4  ;;  %v2423_v42 = vld [vmem:[%s2663_s6] sm:$0xff]  }
0x12d2   :  { %v728_v49 = vpop.permute.xlu0 %727 }
0x12d3   :  { %v730_v50 = vmul.f32 %v2105_v40, %v728_v49 }
0x12d5   :  { %v2413_v51 = vpack.c.bf16 %v730_v50, %v730_v50 }
0x12d6   :  { %v331_v52 = vpop.permute.xlu0 %330 }
0x12d7   :  { %334 = vst.msk [vmem:[#allocation3 + $0x4] sm:$0xf] %vm252_vm3, %v331_v52  ;;  %742 = vrot.lane.b32.xlu1 %v2413_v51, %s2186_s4 }
0x12da   :  { %v493_v53 = vpop.permute.xlu0 %492 }
0x12db   :  { %496 = vst.msk [vmem:[#allocation3 + $0xc] sm:$0xf] %vm252_vm3, %v493_v53 }
0x12de   :  { %v2046_v59 = vld [vmem:[#allocation3] sm:$0xff]  }
0x12df   :  { %1958 = vmatprep.mubr.msk.bf16.mxu0 %vm176_vm2, %v2046_v59 }
0x12e2   :  { %v2047_v54 = vld [vmem:[#allocation3 + $0x8] sm:$0xff]  }
0x12e3   :  { %1959 = vmatmul.mubr.msk.bf16.vlgmr.msra.gmra.mrb[20].mxu0 %vm176_vm2, %v2047_v54 }
0x12e4   :  { %1983 = vmatpush3.bf16.msra.mxu0 %v2423_v42 }
0x12e5   :  { %1984 = vmatprep.subr.bf16.mxu0 %v2182_v0 }
0x12e8   :  { %1985 = vmatpush3.bf16.msra.mxu0 %v2431_v60 }
0x12e9   :  { %1998 = vmatprep.subr.bf16.mxu0 %v2182_v0 }
0x1349   :  { %v743_v61 = vpop.permute.xlu1 %742 }
0x134a   :  { %1951 = vmatmul.mubr.msk.bf16.vlgmr.msra.gmra.mrb[16].mxu1 %vm176_vm2, %v743_v61 }
0x134b   :  { %1967 = vmatpush3.bf16.msra.mxu1 %v2423_v42  ;;  %1970 = vmatprep.mubr.msk.bf16.mxu1 %vm2183_vm0, %v2182_v0 }
0x134c   :  { %1968 = vmatprep.subr.bf16.mxu1 %v2182_v0 }
0x134f   :  { %1969 = vmatpush3.bf16.msra.mxu1 %v2431_v60 }
0x1350   :  { %1974 = vmatprep.subr.bf16.mxu1 %v2182_v0 }
0x1352   :  { %1971 = vmatmul.mubr.bf16.vlgmr.msra.gmra.mrb[20].mxu1 %v2184_v3  ;;  %v152_v3 = vadd.f32 %v2320_v57, %v2277_v7 }
0x1353   :  { %1975 = vmatpush3.bf16.msra.mxu1 %v2423_v42  ;;  %1978 = vmatprep.mubr.msk.bf16.mxu1 %vm2183_vm0, %v2182_v0 }
0x1354   :  { %1976 = vmatprep.subr.bf16.mxu1 %v2182_v0 }
0x1357   :  { %1977 = vmatpush3.bf16.msra.mxu1 %v2431_v60 }
0x1358   :  { %1990 = vmatprep.subr.bf16.mxu1 %v2182_v0 }
0x13b6   :  { %v2449_v56 = vpop.f32.mrb[20].mxu0 }
0x13b7   :  { %v922_v62 = vpop.f32.mrb[21].mxu0 }
0x13b8   :  { %v2451_v63 = vpop.f32.mrb[22].mxu0  ;;  %v923_v15 = vadd.f32 %v2460_v14, %v922_v62 }
0x13b9   :  { %v2453_v1 = vpop.f32.mrb[23].mxu0 }
0x13ba   :  { %v926_v46 = vadd.f32 %v2460_v14, %v2453_v1 }
0x141d   :  { %v781_v4 = vpop.f32.mrb[16].mxu1 }
0x141e   :  { %v787_v5 = vadd.f32 %v781_v4, %v152_v3  ;;  %v1952_v10 = vpop.f32.mrb[17].mxu1 }
0x141f   :  { %v784_v12 = vpop.f32.mrb[18].mxu1 }
0x1420   :  { %v1953_v13 = vpop.f32.mrb[19].mxu1  ;;  %v1748_v29 = vmul.f32 -1.442695, %v787_v5 }
0x1425   :  { %v1008_v8 = vpop.f32.mrb[20].mxu1 }
0x1426   :  { %v1014_v16 = vadd.f32 %v1008_v8, %v923_v15  ;;  %v1972_v17 = vpop.f32.mrb[21].mxu1 }
0x1427   :  { %v1011_v2 = vpop.f32.mrb[22].mxu1 }
0x1428   :  { %2108 = vtanh.f32 %v1014_v16  ;;  %v1973_v18 = vpop.f32.mrb[23].mxu1  ;;  %v1763_v7 = vmul.f32 -1.442695, %v1014_v16 }
0x142a   :  { %2110 = vpow2.f32 %v1763_v7 }
0x1432   :  { %v2109_v19 = vpop.eup %2108 }
0x1433   :  { %1024 = vrot.lane.b32.xlu0 %v2109_v19, %s2185_s15 }
0x1434   :  { %v2111_v57 = vpop.eup %2110 }
0x1435   :  { %v1018_v6 = vadd.f32 1.0, %v2111_v57  ;;  %v931_v57 = vadd.f32 %v2449_v56, %v2460_v14 }
0x1437   :  { %2112 = vrcp.f32 %v1018_v6 }
0x1441   :  { %v2113_v20 = vpop.eup %2112 }
0x1442   :  { %v1022_v23 = vmul.f32 0.0, %v2113_v20 }
0x14a5   :  { %v1025_v22 = vpop.permute.xlu0 %1024 }
0x14a6   :  { %v1027_v58 = vmul.f32 %v2113_v20, %v1025_v22 }
0x14a8   :  { %1029 = vrot.lane.b32.xlu1 %v1027_v58, %s2186_s4 }
0x151a   :  { %v1030_v24 = vpop.permute.xlu1 %1029 }
0x151b   :  { %v1032_v25 = vadd.f32 %v1030_v24, %v1022_v23 }
0x151d   :  { %2114 = vtanh.f32 %v1032_v25 }
0x151e   :  { %2116 = vtanh.f32 %v787_v5 }
0x151f   :  { %2118 = vpow2.f32 %v1748_v29 }
0x1527   :  { %v2115_v26 = vpop.eup %2114 }
0x1528   :  { %1035 = vrot.lane.b32.xlu0 %v2115_v26, %s2185_s15  ;;  %v2117_v27 = vpop.eup %2116 }
0x1529   :  { %v2119_v30 = vpop.eup %2118 }
0x152a   :  { %v791_v32 = vadd.f32 1.0, %v2119_v30 }
0x152c   :  { %797 = vrot.lane.b32.xlu0 %v2117_v27, %s2185_s15  ;;  %2120 = vrcp.f32 %v791_v32 }
0x1536   :  { %v2121_v36 = vpop.eup %2120 }
0x1537   :  { %v795_v39 = vmul.f32 %v2121_v36, %v2396_v45 }
0x159a   :  { %v1036_v33 = vpop.permute.xlu0 %1035 }
0x159b   :  { %v1038_v34 = vmul.f32 %v2113_v20, %v1036_v33 }
0x159d   :  { %v2467_v35 = vpack.c.bf16 %v1038_v34, %v1038_v34 }
0x159e   :  { %v798_v11 = vpop.permute.xlu0 %797 }
0x159f   :  { %v800_v37 = vmul.f32 %v2121_v36, %v798_v11  ;;  %1048 = vrot.lane.b32.xlu1 %v2467_v35, %s2186_s4 }
0x15a1   :  { %802 = vrot.lane.b32.xlu0 %v800_v37, %s2186_s4 }
0x1611   :  { %v1049_v38 = vpop.permute.xlu1 %1048 }
0x1612   :  { %1979 = vmatmul.mubr.msk.bf16.vlgmr.msra.gmra.mrb[24].mxu1 %vm176_vm2, %v1049_v38 }
0x1613   :  { %v803_v40 = vpop.permute.xlu0 %802  ;;  %1991 = vmatpush3.bf16.msra.mxu1 %v2423_v42  ;;  %1994 = vmatprep.mubr.msk.bf16.mxu1 %vm2183_vm0, %v2182_v0 }
0x1614   :  { %v805_v41 = vadd.f32 %v803_v40, %v795_v39  ;;  %1992 = vmatprep.subr.bf16.mxu1 %v2182_v0  ;;  %v934_v40 = vadd.f32 %v2451_v63, %v2460_v14 }
0x1616   :  { %2122 = vtanh.f32 %v805_v41 }
0x1617   :  { %1993 = vmatpush3.bf16.msra.mxu1 %v2431_v60 }
0x1618   :  { %2006 = vmatprep.subr.bf16.mxu1 %v2182_v0 }
0x1620   :  { %v2123_v43 = vpop.eup %2122 }
0x1621   :  { %808 = vrot.lane.b32.xlu0 %v2123_v43, %s2185_s15 }
0x1625   :  { %573 = vrot.lane.b32.xlu0 %v2367_v9, %s2186_s4 }
0x1629   :  { %735 = vrot.lane.b32.xlu0 %v2413_v51, %s2186_s4 }
0x1693   :  { %v809_v55 = vpop.permute.xlu0 %808 }
0x1694   :  { %v811_v4 = vmul.f32 %v2121_v36, %v809_v55 }
0x1696   :  { %v1793_v5 = vpack.c.bf16 %v811_v4, %v811_v4 }
0x1697   :  { %v574_v44 = vpop.permute.xlu0 %573 }
0x1698   :  { %577 = vst.msk [vmem:[#allocation3 + $0x10] sm:$0xf] %vm252_vm3, %v574_v44 }
0x169b   :  { %v736_v45 = vpop.permute.xlu0 %735 }
0x169c   :  { %739 = vst.msk [vmem:[#allocation3 + $0x18] sm:$0xf] %vm252_vm3, %v736_v45 }
0x16e5   :  { %v1087_v47 = vpop.f32.mrb[24].mxu1 }
0x16e6   :  { %v1093_v48 = vadd.f32 %v1087_v47, %v926_v46  ;;  %v1980_v31 = vpop.f32.mrb[25].mxu1 }
0x16e7   :  { %v1090_v21 = vpop.f32.mrb[26].mxu1 }
0x16e8   :  { %2124 = vtanh.f32 %v1093_v48  ;;  %v1981_v49 = vpop.f32.mrb[27].mxu1  ;;  %v1766_v50 = vmul.f32 -1.442695, %v1093_v48 }
0x16ea   :  { %2126 = vpow2.f32 %v1766_v50 }
0x16f2   :  { %v2125_v9 = vpop.eup %2124 }
0x16f3   :  { %1103 = vrot.lane.b32.xlu1 %v2125_v9, %s2185_s15 }
0x16f4   :  { %v2127_v51 = vpop.eup %2126 }
0x16f5   :  { %v1097_v52 = vadd.f32 1.0, %v2127_v51 }
0x16f7   :  { %2128 = vrcp.f32 %v1097_v52 }
0x1701   :  { %v2129_v53 = vpop.eup %2128 }
0x1702   :  { %v1101_v61 = vmul.f32 %v2129_v53, %v1032_v25 }
0x1765   :  { %v1104_v59 = vpop.permute.xlu1 %1103 }
0x1766   :  { %v1106_v54 = vmul.f32 %v2129_v53, %v1104_v59 }
0x1768   :  { %1108 = vrot.lane.b32.xlu1 %v1106_v54, %s2186_s4 }
0x17da   :  { %v1109_v62 = vpop.permute.xlu1 %1108 }
0x17db   :  { %v1111_v1 = vadd.f32 %v1109_v62, %v1101_v61 }
0x17dd   :  { %2130 = vtanh.f32 %v1111_v1 }
0x17e7   :  { %v2131_v3 = vpop.eup %2130 }
0x17e8   :  { %1114 = vrot.lane.b32.xlu1 %v2131_v3, %s2185_s15 }
0x17ec   :  { %654 = vrot.lane.b32.xlu1 %v2383_v28, %s2186_s4 }
0x17f0   :  { %816 = vrot.lane.b32.xlu1 %v1793_v5, %s2186_s4 }
0x185a   :  { %v1115_v10 = vpop.permute.xlu1 %1114 }
0x185b   :  { %v1117_v12 = vmul.f32 %v2129_v53, %v1115_v10 }
0x185d   :  { %v2495_v13 = vpack.c.bf16 %v1117_v12, %v1117_v12 }
0x185e   :  { %v655_v15 = vpop.permute.xlu1 %654 }
0x185f   :  { %658 = vst.msk [vmem:[#allocation3 + $0x14] sm:$0xf] %vm252_vm3, %v655_v15  ;;  %1127 = vrot.lane.b32.xlu0 %v2495_v13, %s2186_s4 }
0x1862   :  { %v817_v8 = vpop.permute.xlu1 %816 }
0x1863   :  { %820 = vst.msk [vmem:[#allocation3 + $0x1c] sm:$0xf] %vm252_vm3, %v817_v8 }
0x1866   :  { %v2050_v16 = vld [vmem:[#allocation3 + $0x10] sm:$0xff]  }
0x1867   :  { %1962 = vmatprep.mubr.msk.bf16.mxu0 %vm176_vm2, %v2050_v16 }
0x186a   :  { %v2051_v28 = vld [vmem:[#allocation3 + $0x18] sm:$0xff]  }
0x186b   :  { %1963 = vmatmul.mubr.msk.bf16.gmra.mrb[24].mxu0 %vm176_vm2, %v2051_v28 }
0x186c   :  { %1986 = vmatprep.mubr.msk.bf16.mxu0 %vm2183_vm0, %v2182_v0 }
0x18d1   :  { %v1128_v17 = vpop.permute.xlu0 %1127 }
0x18d2   :  { %1987 = vmatmul.mubr.msk.bf16.vlgmr.msra.gmra.mrb[28].mxu0 %vm176_vm2, %v1128_v17 }
0x18d3   :  { %1999 = vmatpush3.bf16.msra.mxu0 %v2423_v42  ;;  %2002 = vmatprep.mubr.msk.bf16.mxu0 %vm2183_vm0, %v2182_v0 }
0x18d4   :  { %2000 = vmatprep.subr.bf16.mxu0 %v2182_v0 }
0x18d7   :  { %2001 = vmatpush3.bf16.msra.mxu0 %v2431_v60 }
0x18d8   :  { %2014 = vmatprep.subr.bf16.mxu0 %v2182_v0 }
0x193e   :  { %v2512_v2 = vpop.f32.mrb[24].mxu0 }
0x193f   :  { %v2514_v18 = vpop.f32.mrb[25].mxu0 }
0x1940   :  { %v2516_v19 = vpop.f32.mrb[26].mxu0  ;;  %v939_v62 = vadd.f32 %v2460_v14, %v2514_v18 }
0x1941   :  { %v2518_v7 = vpop.f32.mrb[27].mxu0 }
0x19a5   :  { %v1166_v6 = vpop.f32.mrb[28].mxu0 }
0x19a6   :  { %v1172_v20 = vadd.f32 %v1166_v6, %v931_v57  ;;  %v1988_v22 = vpop.f32.mrb[29].mxu0 }
0x19a7   :  { %v1169_v58 = vpop.f32.mrb[30].mxu0 }
0x19a8   :  { %2132 = vtanh.f32 %v1172_v20  ;;  %v1989_v23 = vpop.f32.mrb[31].mxu0  ;;  %v1769_v25 = vmul.f32 -1.442695, %v1172_v20 }
0x19aa   :  { %2134 = vpow2.f32 %v1769_v25 }
0x19b2   :  { %v2133_v24 = vpop.eup %2132 }
0x19b3   :  { %1182 = vrot.lane.b32.xlu1 %v2133_v24, %s2185_s15 }
0x19b4   :  { %v2135_v26 = vpop.eup %2134 }
0x19b5   :  { %v1176_v27 = vadd.f32 1.0, %v2135_v26  ;;  %v942_v26 = vadd.f32 %v2460_v14, %v2518_v7 }
0x19b7   :  { %2136 = vrcp.f32 %v1176_v27 }
0x19c1   :  { %v2137_v29 = vpop.eup %2136 }
0x19c2   :  { %v1180_v56 = vmul.f32 %v2137_v29, %v1111_v1 }
0x1a25   :  { %v1183_v30 = vpop.permute.xlu1 %1182 }
0x1a26   :  { %v1185_v32 = vmul.f32 %v2137_v29, %v1183_v30 }
0x1a28   :  { %1187 = vrot.lane.b32.xlu0 %v1185_v32, %s2186_s4 }
0x1a9a   :  { %v1188_v33 = vpop.permute.xlu0 %1187 }
0x1a9b   :  { %v1190_v34 = vadd.f32 %v1188_v33, %v1180_v56 }
0x1a9d   :  { %2138 = vtanh.f32 %v1190_v34 }
0x1aa7   :  { %v2139_v36 = vpop.eup %2138 }
0x1aa8   :  { %1193 = vrot.lane.b32.xlu1 %v2139_v36, %s2185_s15 }
0x1b1a   :  { %v1194_v11 = vpop.permute.xlu1 %1193 }
0x1b1b   :  { %v1196_v37 = vmul.f32 %v2137_v29, %v1194_v11 }
0x1b1d   :  { %v2525_v38 = vpack.c.bf16 %v1196_v37, %v1196_v37 }
0x1b1f   :  { %1206 = vrot.lane.b32.xlu0 %v2525_v38, %s2186_s4 }
0x1b91   :  { %v1207_v39 = vpop.permute.xlu0 %1206 }
0x1b92   :  { %1995 = vmatmul.mubr.msk.bf16.vlgmr.msra.gmra.mrb[28].mxu1 %vm176_vm2, %v1207_v39 }
0x1b93   :  { %2007 = vmatpush3.bf16.msra.mxu1 %v2423_v42  ;;  %2010 = vmatprep.mubr.msk.bf16.mxu1 %vm2183_vm0, %v2182_v0 }
0x1b94   :  { %2008 = vmatprep.subr.bf16.mxu1 %v2182_v0 }
0x1b97   :  { %2009 = vmatpush3.bf16.msra.mxu1 %v2431_v60 }
0x1b98   :  { %2022 = vmatprep.subr.bf16.mxu1 %v2182_v0 }
0x1c65   :  { %v1245_v41 = vpop.f32.mrb[28].mxu1 }
0x1c66   :  { %v1251_v43 = vadd.f32 %v1245_v41, %v934_v40  ;;  %v1996_v55 = vpop.f32.mrb[29].mxu1 }
0x1c67   :  { %v1248_v44 = vpop.f32.mrb[30].mxu1 }
0x1c68   :  { %2140 = vtanh.f32 %v1251_v43  ;;  %v1997_v45 = vpop.f32.mrb[31].mxu1  ;;  %v1772_v47 = vmul.f32 -1.442695, %v1251_v43 }
0x1c69   :  { %v947_v45 = vadd.f32 %v2512_v2, %v2460_v14 }
0x1c6a   :  { %2142 = vpow2.f32 %v1772_v47 }
0x1c72   :  { %v2141_v46 = vpop.eup %2140 }
0x1c73   :  { %1261 = vrot.lane.b32.xlu1 %v2141_v46, %s2185_s15 }
0x1c74   :  { %v2143_v48 = vpop.eup %2142 }
0x1c75   :  { %v1255_v31 = vadd.f32 1.0, %v2143_v48 }
0x1c77   :  { %2144 = vrcp.f32 %v1255_v31 }
0x1c81   :  { %v2145_v21 = vpop.eup %2144 }
0x1c82   :  { %v1259_v63 = vmul.f32 %v2145_v21, %v1190_v34 }
0x1ce5   :  { %v1262_v49 = vpop.permute.xlu1 %1261 }
0x1ce6   :  { %v1264_v9 = vmul.f32 %v2145_v21, %v1262_v49 }
0x1ce8   :  { %1266 = vrot.lane.b32.xlu0 %v1264_v9, %s2186_s4 }
0x1d5a   :  { %v1267_v50 = vpop.permute.xlu0 %1266 }
0x1d5b   :  { %v1269_v51 = vadd.f32 %v1267_v50, %v1259_v63 }
0x1d5d   :  { %2146 = vtanh.f32 %v1269_v51 }
0x1d67   :  { %v2147_v52 = vpop.eup %2146 }
0x1d68   :  { %1272 = vrot.lane.b32.xlu1 %v2147_v52, %s2185_s15 }
0x1dda   :  { %v1273_v53 = vpop.permute.xlu1 %1272 }
0x1ddb   :  { %v1275_v59 = vmul.f32 %v2145_v21, %v1273_v53 }
0x1ddd   :  { %v2541_v54 = vpack.c.bf16 %v1275_v59, %v1275_v59 }
0x1ddf   :  { %1285 = vrot.lane.b32.xlu0 %v2541_v54, %s2186_s4 }
0x1e51   :  { %v1286_v61 = vpop.permute.xlu0 %1285 }
0x1e52   :  { %2003 = vmatmul.mubr.msk.bf16.vlgmr.msra.gmra.mrb[32].mxu0 %vm176_vm2, %v1286_v61 }
0x1e53   :  { %2015 = vmatpush3.bf16.msra.mxu0 %v2423_v42  ;;  %2018 = vmatprep.mubr.msk.bf16.mxu0 %vm2183_vm0, %v2182_v0 }
0x1e54   :  { %2016 = vmatprep.subr.bf16.mxu0 %v2182_v0 }
0x1e57   :  { %2017 = vmatpush3.bf16.msra.mxu0 %v2431_v60 }
0x1f25   :  { %v1324_v1 = vpop.f32.mrb[32].mxu0 }
0x1f26   :  { %v1330_v3 = vadd.f32 %v1324_v1, %v939_v62  ;;  %v2004_v4 = vpop.f32.mrb[33].mxu0 }
0x1f27   :  { %v1327_v5 = vpop.f32.mrb[34].mxu0 }
0x1f28   :  { %2148 = vtanh.f32 %v1330_v3  ;;  %v2005_v10 = vpop.f32.mrb[35].mxu0  ;;  %v1775_v15 = vmul.f32 -1.442695, %v1330_v3 }
0x1f29   :  { %v950_v10 = vadd.f32 %v2516_v19, %v2460_v14  ;;  %v1600_v14 = vld [vmem:[%s2665_s1] sm:$0xff] }
0x1f2a   :  { %2150 = vpow2.f32 %v1775_v15  ;;  %v1688_v19 = vsel %vm1687_vm4, %v1600_v14, 0.0 }
0x1f32   :  { %v2149_v12 = vpop.eup %2148 }
0x1f33   :  { %1340 = vrot.lane.b32.xlu1 %v2149_v12, %s2185_s15 }
0x1f34   :  { %v2151_v8 = vpop.eup %2150 }
0x1f35   :  { %v1334_v16 = vadd.f32 1.0, %v2151_v8 }
0x1f37   :  { %2152 = vrcp.f32 %v1334_v16 }
0x1f41   :  { %v2153_v28 = vpop.eup %2152 }
0x1f42   :  { %v1338_v18 = vmul.f32 %v2153_v28, %v1269_v51 }
0x1fa5   :  { %v1341_v17 = vpop.permute.xlu1 %1340 }
0x1fa6   :  { %v1343_v57 = vmul.f32 %v2153_v28, %v1341_v17 }
0x1fa8   :  { %1345 = vrot.lane.b32.xlu0 %v1343_v57, %s2186_s4 }
0x201a   :  { %v1346_v6 = vpop.permute.xlu0 %1345 }
0x201b   :  { %v1348_v20 = vadd.f32 %v1346_v6, %v1338_v18 }
0x201d   :  { %2154 = vtanh.f32 %v1348_v20 }
0x2027   :  { %v2155_v22 = vpop.eup %2154 }
0x2028   :  { %1351 = vrot.lane.b32.xlu1 %v2155_v22, %s2185_s15 }
0x209a   :  { %v1352_v58 = vpop.permute.xlu1 %1351 }
0x209b   :  { %v1354_v23 = vmul.f32 %v2153_v28, %v1352_v58 }
0x209d   :  { %v2556_v24 = vpack.c.bf16 %v1354_v23, %v1354_v23  ;;  %v1601_v23 = vld [vmem:[%s2665_s1 + $0x8] sm:$0xff] }
0x209f   :  { %1364 = vrot.lane.b32.xlu0 %v2556_v24, %s2186_s4 }
0x2111   :  { %v1365_v25 = vpop.permute.xlu0 %1364 }
0x2112   :  { %2011 = vmatmul.mubr.msk.bf16.vlgmr.msra.gmra.mrb[32].mxu1 %vm176_vm2, %v1365_v25  ;;  %v1689_v25 = vsel %vm1687_vm4, %v1601_v23, 0.0 }
0x2113   :  { %2023 = vmatpush3.bf16.msra.mxu1 %v2423_v42  ;;  %2026 = vmatprep.mubr.msk.bf16.mxu1 %vm2183_vm0, %v2182_v0 }
0x2114   :  { %2024 = vmatprep.subr.bf16.mxu1 %v2182_v0 }
0x2117   :  { %2025 = vmatpush3.bf16.msra.mxu1 %v2431_v60 }
0x21e5   :  { %v1403_v27 = vpop.f32.mrb[32].mxu1 }
0x21e6   :  { %v1409_v29 = vadd.f32 %v1403_v27, %v942_v26  ;;  %v2012_v30 = vpop.f32.mrb[33].mxu1  ;;  %v1690_v26 = vadd.f32 %v1689_v25, %v1688_v19  ;;  %v1603_v27 = vld [vmem:[%s2665_s1 + $0x18] sm:$0xff] }
0x21e7   :  { %v1406_v32 = vpop.f32.mrb[34].mxu1  ;;  %v1693_v30 = vsel %vm1687_vm4, %v1603_v27, 0.0 }
0x21e8   :  { %2156 = vtanh.f32 %v1409_v29  ;;  %v2013_v56 = vpop.f32.mrb[35].mxu1  ;;  %v1778_v42 = vmul.f32 -1.442695, %v1409_v29  ;;  %v1604_v32 = vld [vmem:[%s2665_s1 + $0x20] sm:$0xff] }
0x21ea   :  { %2158 = vpow2.f32 %v1778_v42 }
0x21f2   :  { %v2157_v33 = vpop.eup %2156 }
0x21f3   :  { %1419 = vrot.lane.b32.xlu1 %v2157_v33, %s2185_s15  ;;  %v1695_v33 = vsel %vm1687_vm4, %v1604_v32, 0.0 }
0x21f4   :  { %v2159_v34 = vpop.eup %2158 }
0x21f5   :  { %v1413_v36 = vadd.f32 1.0, %v2159_v34  ;;  %v1606_v34 = vld [vmem:[%s2665_s1 + $0x30] sm:$0xff] }
0x21f7   :  { %2160 = vrcp.f32 %v1413_v36 }
0x2201   :  { %v2161_v0 = vpop.eup %2160 }
0x2202   :  { %v1417_v7 = vmul.f32 %v2161_v0, %v1348_v20 }
0x2265   :  { %v1420_v11 = vpop.permute.xlu1 %1419 }
0x2266   :  { %v1422_v60 = vmul.f32 %v2161_v0, %v1420_v11 }
0x2268   :  { %1424 = vrot.lane.b32.xlu0 %v1422_v60, %s2186_s4 }
0x22da   :  { %v1425_v37 = vpop.permute.xlu0 %1424 }
0x22db   :  { %v1427_v39 = vadd.f32 %v1425_v37, %v1417_v7  ;;  %v1607_v7 = vld [vmem:[%s2665_s1 + $0x38] sm:$0xff] }
0x22dc   :  { %v1701_v37 = vsel %vm1687_vm4, %v1607_v7, 0.0 }
0x22dd   :  { %2162 = vtanh.f32 %v1427_v39 }
0x22e7   :  { %v2163_v40 = vpop.eup %2162 }
0x22e8   :  { %1430 = vrot.lane.b32.xlu1 %v2163_v40, %s2185_s15 }
0x235a   :  { %v1431_v41 = vpop.permute.xlu1 %1430 }
0x235b   :  { %v1433_v43 = vmul.f32 %v2161_v0, %v1431_v41  ;;  %v1699_v0 = vsel %vm1687_vm4, %v1606_v34, 0.0 }
0x235d   :  { %v2571_v55 = vpack.c.bf16 %v1433_v43, %v1433_v43 }
0x235f   :  { %1443 = vrot.lane.b32.xlu0 %v2571_v55, %s2186_s4 }
0x23d1   :  { %v1444_v44 = vpop.permute.xlu0 %1443 }
0x23d2   :  { %2019 = vmatmul.mubr.msk.bf16.vlgmr.msra.gmra.mrb[36].mxu0 %vm176_vm2, %v1444_v44 }
0x24a5   :  { %v1482_v46 = vpop.f32.mrb[36].mxu0 }
0x24a6   :  { %v1488_v47 = vadd.f32 %v1482_v46, %v947_v45  ;;  %v2020_v48 = vpop.f32.mrb[37].mxu0 }
0x24a7   :  { %v1485_v31 = vpop.f32.mrb[38].mxu0 }
0x24a8   :  { %2164 = vtanh.f32 %v1488_v47  ;;  %v2021_v21 = vpop.f32.mrb[39].mxu0  ;;  %v1781_v9 = vmul.f32 -1.442695, %v1488_v47 }
0x24aa   :  { %2166 = vpow2.f32 %v1781_v9 }
0x24b2   :  { %v2165_v49 = vpop.eup %2164 }
0x24b3   :  { %1498 = vrot.lane.b32.xlu1 %v2165_v49, %s2185_s15 }
0x24b4   :  { %v2167_v63 = vpop.eup %2166 }
0x24b5   :  { %v1492_v50 = vadd.f32 1.0, %v2167_v63 }
0x24b7   :  { %2168 = vrcp.f32 %v1492_v50 }
0x24c1   :  { %v2169_v51 = vpop.eup %2168 }
0x24c2   :  { %v1496_v2 = vmul.f32 %v2169_v51, %v1427_v39 }
0x2525   :  { %v1499_v52 = vpop.permute.xlu1 %1498 }
0x2526   :  { %v1501_v53 = vmul.f32 %v2169_v51, %v1499_v52 }
0x2528   :  { %1503 = vrot.lane.b32.xlu0 %v1501_v53, %s2186_s4 }
0x259a   :  { %v1504_v59 = vpop.permute.xlu0 %1503 }
0x259b   :  { %v1506_v61 = vadd.f32 %v1504_v59, %v1496_v2 }
0x259d   :  { %2170 = vtanh.f32 %v1506_v61 }
0x25a7   :  { %v2171_v62 = vpop.eup %2170 }
0x25a8   :  { %1509 = vrot.lane.b32.xlu1 %v2171_v62, %s2185_s15 }
0x261a   :  { %v1510_v1 = vpop.permute.xlu1 %1509 }
0x261b   :  { %v1512_v3 = vmul.f32 %v2169_v51, %v1510_v1 }
0x261d   :  { %v2581_v4 = vpack.c.bf16 %v1512_v3, %v1512_v3 }
0x261f   :  { %1522 = vrot.lane.b32.xlu0 %v2581_v4, %s2186_s4 }
0x2691   :  { %v1523_v5 = vpop.permute.xlu0 %1522 }
0x2692   :  { %2027 = vmatmul.mubr.msk.bf16.vlgmr.msra.gmra.mrb[36].mxu1 %vm176_vm2, %v1523_v5 }
0x2765   :  { %v1561_v12 = vpop.f32.mrb[36].mxu1 }
0x2766   :  { %v1567_v15 = vadd.f32 %v1561_v12, %v950_v10  ;;  %v2028_v8 = vpop.f32.mrb[37].mxu1 }
0x2767   :  { %v1564_v16 = vpop.f32.mrb[38].mxu1 }
0x2768   :  { %2172 = vtanh.f32 %v1567_v15  ;;  %v2029_v28 = vpop.f32.mrb[39].mxu1  ;;  %v1784_v57 = vmul.f32 -1.442695, %v1567_v15 }
0x276a   :  { %2174 = vpow2.f32 %v1784_v57 }
0x2772   :  { %v2173_v17 = vpop.eup %2172 }
0x2773   :  { %1577 = vrot.lane.b32.xlu1 %v2173_v17, %s2185_s15 }
0x2774   :  { %v2175_v18 = vpop.eup %2174 }
0x2775   :  { %v1571_v6 = vadd.f32 1.0, %v2175_v18 }
0x2777   :  { %2176 = vrcp.f32 %v1571_v6 }
0x2781   :  { %v2177_v20 = vpop.eup %2176 }
0x2782   :  { %v1575_v40 = vmul.f32 %v2177_v20, %v1506_v61 }
0x27e5   :  { %v1578_v22 = vpop.permute.xlu1 %1577 }
0x27e6   :  { %v1580_v58 = vmul.f32 %v2177_v20, %v1578_v22 }
0x27e8   :  { %1582 = vrot.lane.b32.xlu0 %v1580_v58, %s2186_s4 }
0x27ec   :  { %1043 = vrot.lane.b32.xlu0 %v2467_v35, %s2186_s4  ;;  %v1602_v35 = vld [vmem:[%s2665_s1 + $0x10] sm:$0xff] }
0x27f0   :  { %1201 = vrot.lane.b32.xlu0 %v2525_v38, %s2186_s4  ;;  %v1691_v38 = vsel %vm1687_vm4, %v1602_v35, 0.0 }
0x27f1   :  { %v1692_v29 = vadd.f32 %v1691_v38, %v1690_v26 }
0x27f3   :  { %v1694_v56 = vadd.f32 %v1693_v30, %v1692_v29 }
0x27f4   :  { %1626 = vperm.xlu0 %2035, %v1600_v14  }
0x27f5   :  { %v1696_v42 = vadd.f32 %v1695_v33, %v1694_v56 }
0x27f8   :  { %1359 = vrot.lane.b32.xlu0 %v2556_v24, %s2186_s4  ;;  %v1605_v24 = vld [vmem:[%s2665_s1 + $0x28] sm:$0xff] }
0x27f9   :  { %v1697_v36 = vsel %vm1687_vm4, %v1605_v24, 0.0 }
0x27fa   :  { %v1698_v11 = vadd.f32 %v1697_v36, %v1696_v42 }
0x27fc   :  { %1641 = vperm.xlu0 %2035, %v1603_v27   ;;  %v1700_v60 = vadd.f32 %v1699_v0, %v1698_v11 }
0x27fe   :  { %v1702_v39 = vadd.f32 %v1701_v37, %v1700_v60 }
0x2800   :  { %1705 = vperm.xlu0 %2035, %v1702_v39  }
0x285a   :  { %v1583_v41 = vpop.permute.xlu0 %1582 }
0x285b   :  { %v1585_v43 = vadd.f32 %v1583_v41, %v1575_v40 }
0x285d   :  { %2178 = vtanh.f32 %v1585_v43 }
0x285e   :  { %v1044_v44 = vpop.permute.xlu0 %1043 }
0x285f   :  { %1046 = vst.msk [vmem:[#allocation3] sm:$0xf] %vm252_vm3, %v1044_v44 }
0x2862   :  { %v1202_v45 = vpop.permute.xlu0 %1201 }
0x2863   :  { %1204 = vst.msk [vmem:[#allocation3 + $0x8] sm:$0xf] %vm252_vm3, %v1202_v45 }
0x2867   :  { %v2179_v46 = vpop.eup %2178 }
0x2868   :  { %1588 = vrot.lane.b32.xlu1 %v2179_v46, %s2185_s15 }
0x286c   :  { %1122 = vrot.lane.b32.xlu1 %v2495_v13, %s2186_s4 }
0x2870   :  { %1280 = vrot.lane.b32.xlu1 %v2541_v54, %s2186_s4 }
0x2873   :  { %v1627_v47 = vpop.permute.xlu0 %1626 }
0x2874   :  { %1631 = vperm.xlu1 %2036, %v1601_v23  }
0x2877   :  { %v1360_v48 = vpop.permute.xlu0 %1359 }
0x2878   :  { %1362 = vst.msk [vmem:[#allocation3 + $0x10] sm:$0xf] %vm252_vm3, %v1360_v48  ;;  %1636 = vperm.xlu1 %2036, %v1602_v35  }
0x287b   :  { %v1642_v15 = vpop.permute.xlu0 %1641 }
0x287c   :  { %1438 = vrot.lane.b32.xlu1 %v2571_v55, %s2186_s4 }
0x287f   :  { %v1706_v14 = vpop.permute.xlu0 %1705 }
0x2880   :  { %1646 = vperm.xlu1 %2036, %v1604_v32   ;;  %2180 = vrcp.f32 %v1706_v14 }
0x2884   :  { %1517 = vrot.lane.b32.xlu1 %v2581_v4, %s2186_s4 }
0x2888   :  { %1651 = vperm.xlu1 %2036, %v1605_v24  }
0x288a   :  { %v2181_v11 = vpop.eup %2180 }
0x288c   :  { %1661 = vperm.xlu1 %2036, %v1607_v7  }
0x28da   :  { %v1589_v31 = vpop.permute.xlu1 %1588 }
0x28db   :  { %v1591_v13 = vmul.f32 %v2177_v20, %v1589_v31 }
0x28dd   :  { %v1801_v21 = vpack.c.bf16 %v1591_v13, %v1591_v13 }
0x28de   :  { %v1123_v49 = vpop.permute.xlu1 %1122 }
0x28df   :  { %1125 = vst.msk [vmem:[#allocation3 + $0x4] sm:$0xf] %vm252_vm3, %v1123_v49  ;;  %1596 = vrot.lane.b32.xlu0 %v1801_v21, %s2186_s4 }
0x28e2   :  { %v1281_v54 = vpop.permute.xlu1 %1280 }
0x28e3   :  { %1283 = vst.msk [vmem:[#allocation3 + $0xc] sm:$0xf] %vm252_vm3, %v1281_v54  ;;  %1656 = vperm.xlu0 %2035, %v1606_v34  }
0x28e6   :  { %v1803_v9 = vld [vmem:[#allocation3] sm:$0xff]  }
0x28e7   :  { %v1804_v55 = vunpack.c.l.bf16 %v1803_v9  ;;  %v1805_v63 = vunpack.c.h.bf16 %v1803_v9 }
0x28e9   :  { %v1664_v52 = vmul.f32 %v1804_v55, %v1627_v47 }
0x28ea   :  { %v1818_v50 = vld [vmem:[#allocation3 + $0x8] sm:$0xff]  }
0x28eb   :  { %v1808_v59 = vunpack.c.l.bf16 %v1818_v50  ;;  %v1672_v62 = vsel %vm176_vm2, %v1664_v52, 0.0  ;;  %v1809_v12 = vunpack.c.h.bf16 %v1818_v50 }
0x28ed   :  { %v1667_v16 = vmul.f32 %v1809_v12, %v1642_v15 }
0x28ef   :  { %v1677_v18 = vsel %vm176_vm2, %v1667_v16, 0.0 }
0x28f3   :  { %v1632_v51 = vpop.permute.xlu1 %1631 }
0x28f4   :  { %v1665_v53 = vmul.f32 %v1805_v63, %v1632_v51 }
0x28f6   :  { %v1673_v2 = vsel %vm176_vm2, %v1665_v53, 0.0 }
0x28f7   :  { %v1637_v61 = vpop.permute.xlu1 %1636  ;;  %v1674_v3 = vadd.f32 %v1673_v2, %v1672_v62 }
0x28f8   :  { %v1666_v1 = vmul.f32 %v1808_v59, %v1637_v61 }
0x28fa   :  { %v1675_v4 = vsel %vm176_vm2, %v1666_v1, 0.0 }
0x28fb   :  { %v1676_v5 = vadd.f32 %v1675_v4, %v1674_v3  ;;  %v1439_v10 = vpop.permute.xlu1 %1438 }
0x28fc   :  { %1441 = vst.msk [vmem:[#allocation3 + $0x14] sm:$0xf] %vm252_vm3, %v1439_v10 }
0x28fd   :  { %v1678_v20 = vadd.f32 %v1677_v18, %v1676_v5 }
0x28ff   :  { %v1647_v8 = vpop.permute.xlu1 %1646 }
0x2903   :  { %v1819_v28 = vld [vmem:[#allocation3 + $0x10] sm:$0xff]   ;;  %v1518_v17 = vpop.permute.xlu1 %1517 }
0x2904   :  { %v1812_v57 = vunpack.c.l.bf16 %v1819_v28  ;;  %1520 = vst.msk [vmem:[#allocation3 + $0x18] sm:$0xf] %vm252_vm3, %v1518_v17  ;;  %v1813_v25 = vunpack.c.h.bf16 %v1819_v28 }
0x2906   :  { %v1668_v6 = vmul.f32 %v1812_v57, %v1647_v8 }
0x2907   :  { %v1652_v23 = vpop.permute.xlu1 %1651 }
0x2908   :  { %v1679_v22 = vsel %vm176_vm2, %v1668_v6, 0.0  ;;  %v1669_v35 = vmul.f32 %v1813_v25, %v1652_v23 }
0x2909   :  { %v1680_v58 = vadd.f32 %v1679_v22, %v1678_v20 }
0x290a   :  { %v1681_v27 = vsel %vm176_vm2, %v1669_v35, 0.0 }
0x290b   :  { %v1662_v30 = vpop.permute.xlu1 %1661  ;;  %v1682_v42 = vadd.f32 %v1681_v27, %v1680_v58 }
0x2951   :  { %v1597_v19 = vpop.permute.xlu0 %1596 }
0x2952   :  { %1599 = vst.msk [vmem:[#allocation3 + $0x1c] sm:$0xf] %vm252_vm3, %v1597_v19 }
0x2959   :  { %v1820_v26 = vld [vmem:[#allocation3 + $0x18] sm:$0xff]  }
0x295a   :  { %v1817_v38 = vunpack.c.h.bf16 %v1820_v26  ;;  %v1816_v29 = vunpack.c.l.bf16 %v1820_v26 }
0x295c   :  { %v1671_v33 = vmul.f32 %v1817_v38, %v1662_v30 }
0x295e   :  { %v1685_v36 = vsel %vm176_vm2, %v1671_v33, 0.0 }
0x2962   :  { %v1657_v32 = vpop.permute.xlu0 %1656 }
0x2963   :  { %v1670_v56 = vmul.f32 %v1816_v29, %v1657_v32 }
0x2965   :  { %v1683_v24 = vsel %vm176_vm2, %v1670_v56, 0.0 }
0x2966   :  { %v1684_v34 = vadd.f32 %v1683_v24, %v1682_v42 }
0x2968   :  { %v1686_v0 = vadd.f32 %v1685_v36, %v1684_v34 }
0x296a   :  { %v1709_v60 = vmul.f32 %v2181_v11, %v1686_v0 }
0x296c   :  { %1710 = vst.msk [vmem:[%s2666_s8] sm:$0xff] %vm176_vm2, %v1709_v60 }

</bundles_post_ra>
